<compile_context>
chip_gen: v7x
topology: tpu7x:2x2x1
jax: 0.10.0
libtpu: 0.0.40
codegen_flags: <defaults>
</compile_context>

<pallas_src>
import functools

import jax
import jax.numpy as jnp
from jax.experimental import pallas as pl
from jax.experimental.pallas import tpu as pltpu

EPS = 1e-6
NEG_SLOPE_VEC = 0.01   # VNLeakyReLU default
NEG_SLOPE_SCA = 0.01   # nn.LeakyReLU default

ACT_DTYPE = jnp.bfloat16            # HBM / VMEM streaming dtype for activations
_LANES = 128
_VMEM_LIMIT = 32 * 1024 * 1024      # safe scoped-VMEM budget on v5e/v6e/v7x (64 MiB phys on v7x)


# --------------------------------------------------------------------------
# In-kernel building blocks.  All activations channel-major [C, T]; vectors are
# flattened component-major [3C, T]; matmul operands bf16, accumulation f32.
# --------------------------------------------------------------------------
def _gvlinear(sca_b, vec_b, wv1_bd, ws, wv2_bd, wg, bg):
    """GVLinear.  sca_b:[S_in,T] bf16, vec_b:[3*V_in,T] bf16.
    wv1_bd:[3H,3V_in] / wv2_bd:[3V_out,3H] block-diag bf16, ws:[S_out,H+S_in] bf16
    (fused over concat([norm; sca])), wg:[V_out,S_out] bf16, bg:[V_out,1] f32."""
    f32, bf16 = jnp.float32, jnp.bfloat16
    h = wv1_bd.shape[0] // 3
    inter = jnp.dot(wv1_bd, vec_b, preferred_element_type=f32)          # [3H, T] f32
    ix, iy, iz = inter[:h], inter[h:2 * h], inter[2 * h:]
    norm = jnp.sqrt(ix * ix + iy * iy + iz * iz)                        # [H, T] f32
    out_sca = jnp.dot(ws, jnp.concatenate([norm.astype(bf16), sca_b], axis=0),
                      preferred_element_type=f32)                       # [S_out, T] f32
    gate = jax.nn.sigmoid(
        jnp.dot(wg, out_sca.astype(bf16), preferred_element_type=f32) + bg)  # [V_out, T]
    out_vec = jnp.dot(wv2_bd, inter.astype(bf16), preferred_element_type=f32)  # [3V_out, T]
    gate3 = jnp.concatenate([gate, gate, gate], axis=0)
    return out_sca, out_vec * gate3


def _vn_leaky_relu(vec_f32, wd_bd, neg=NEG_SLOPE_VEC):
    """vec_f32:[3V,T] f32, wd_bd:[3V,3V] block-diag bf16."""
    f32, bf16 = jnp.float32, jnp.bfloat16
    v = wd_bd.shape[0] // 3
    d = jnp.dot(wd_bd, vec_f32.astype(bf16), preferred_element_type=f32)
    vx, vy, vz = vec_f32[:v], vec_f32[v:2 * v], vec_f32[2 * v:]
    dx, dy, dz = d[:v], d[v:2 * v], d[2 * v:]
    dot = vx * dx + vy * dy + vz * dz
    dns = dx * dx + dy * dy + dz * dz
    coef = dot * pl.reciprocal(dns + EPS, approx=True)   # EUP slot, not VALU divide
    pos = dot >= 0.0

    def act(vc, dc):
        return neg * vc + (1.0 - neg) * jnp.where(pos, vc, vc - coef * dc)

    return jnp.concatenate([act(vx, dx), act(vy, dy), act(vz, dz)], axis=0)


def _leaky_relu(x, neg=NEG_SLOPE_SCA):
    return jnp.where(x >= 0.0, x, neg * x)


# --------------------------------------------------------------------------
# Kernel 1: node GVLinear over all nodes -> combined [out_sca + 3*out_vec, Nn] table.
# --------------------------------------------------------------------------
def _node_kernel(x_ref, wv1_ref, ws_ref, wv2_ref, wg_ref, bg_ref, out_ref):
    hid = wv1_ref.shape[0] // 3
    n_sca = ws_ref.shape[1] - hid
    x = x_ref[...]                                       # [n_sca + 3*n_vec, T] bf16
    s, v = _gvlinear(x[:n_sca], x[n_sca:], wv1_ref[...], ws_ref[...],
                     wv2_ref[...], wg_ref[...], bg_ref[...])
    out_ref[...] = jnp.concatenate([s, v], axis=0).astype(out_ref.dtype)


# --------------------------------------------------------------------------
# Kernel 2 (fused): one-hot node gather + edge_gvp + message mixing + out_gvlinear.
# --------------------------------------------------------------------------
def _edge_kernel(idx_ref, ntab_ref, efeat_ref,
                 e_wv1_ref, e_ws_ref, e_wv2_ref, e_wg_ref, e_wd_ref,
                 w_mix_ref, w_n2e_ref, w_evn_ref,
                 o_wv1_ref, o_ws_ref, o_wv2_ref, o_wg_ref,
                 bias_ref, out_sca_ref, out_vec_ref):
    f32, bf16 = jnp.float32, jnp.bfloat16

    # static channel sizes derived from weight shapes
    hid_e = e_wv1_ref.shape[0] // 3
    e_sca = e_ws_ref.shape[1] - hid_e
    hid_vec = e_wg_ref.shape[0]
    o_vec, o_sca = w_n2e_ref.shape

    # packed per-channel biases (f32), static slices
    b = bias_ref[...]
    o0 = hid_vec
    o1 = o0 + o_sca + o_vec
    o2 = o1 + o_vec
    o3 = o2 + 3 * o_vec
    e_bg, b_mix, b_n2e, b_evn3, o_bg = b[:o0], b[o0:o1], b[o1:o2], b[o2:o3], b[o3:]

    # ---- gather node features for this edge tile via a one-hot matmul (MXU)
    # node table is VMEM-resident (constant index_map); avoids XLA lane-axis gather.
    nn_pad = ntab_ref.shape[1]
    idx = idx_ref[...]                                               # [1, T] int32
    rows = jax.lax.broadcasted_iota(jnp.int32, (nn_pad, idx.shape[-1]), 0)
    onehot = (rows == idx).astype(bf16)                              # [Nn_pad, T]
    nfeat = jnp.dot(ntab_ref[...], onehot, preferred_element_type=f32)  # [o_sca+3*o_vec, T]
    nsca = nfeat[:o_sca]
    nvx = nfeat[o_sca:o_sca + o_vec]
    nvy = nfeat[o_sca + o_vec:o_sca + 2 * o_vec]
    nvz = nfeat[o_sca + 2 * o_vec:]

    # ---- edge_gvp = GVLinear -> VNLeakyReLU (vec) / LeakyReLU (sca)
    ef = efeat_ref[...]                                              # [e_sca+3*e_vec, T] bf16
    es, ev = _gvlinear(ef[:e_sca], ef[e_sca:], e_wv1_ref[...], e_ws_ref[...],
                       e_wv2_ref[...], e_wg_ref[...], e_bg)
    ev = _vn_leaky_relu(ev, e_wd_ref[...])
    es = _leaky_relu(es)

    # ---- message mixing (w_sca/w_e2n stacked into one dot on es)
    mix = jnp.dot(w_mix_ref[...], es.astype(bf16), preferred_element_type=f32) + b_mix
    y_sca = nsca * mix[:o_sca]
    g_e2n = mix[o_sca:]
    g_n2e = jnp.dot(w_n2e_ref[...], nsca.astype(bf16), preferred_element_type=f32) + b_n2e
    evn = jnp.dot(w_evn_ref[...], ev.astype(bf16), preferred_element_type=f32) + b_evn3
    yx = g_e2n * nvx + g_n2e * evn[:o_vec]
    yy = g_e2n * nvy + g_n2e * evn[o_vec:2 * o_vec]
    yz = g_e2n * nvz + g_n2e * evn[2 * o_vec:]
    y_vec = jnp.concatenate([yx, yy, yz], axis=0)

    # ---- out_gvlinear
    os_, ov_ = _gvlinear(y_sca.astype(bf16), y_vec.astype(bf16),
                         o_wv1_ref[...], o_ws_ref[...], o_wv2_ref[...],
                         o_wg_ref[...], o_bg)
    out_sca_ref[...] = os_.astype(out_sca_ref.dtype)
    out_vec_ref[...] = ov_.astype(out_vec_ref.dtype)


# --------------------------------------------------------------------------
# pallas_call wrappers
# --------------------------------------------------------------------------
def _round_up(x, m):
    return (x + m - 1) // m * m


def _pick_tile(n_rows, tile_rows):
    r = _round_up(max(int(n_rows), 1), _LANES)
    # cap so the row grid has >=2 steps (v7x can shard "parallel" over both TCs)
    half = _round_up((r + 1) // 2, _LANES)
    return max(_LANES, min(int(tile_rows), half))


def _const_spec(w):
    nd = w.ndim
    return pl.BlockSpec(tuple(int(s) for s in w.shape), lambda *_: (0,) * nd)


def _cost_estimate(n_rows, weights, io_bytes_per_row, transc_per_row, extra_flops=0):
    wsz = sum(int(w.size) for w in weights)
    return pl.CostEstimate(flops=int(2 * n_rows * wsz + extra_flops),
                           transcendentals=int(n_rows * transc_per_row),
                           bytes_accessed=int(n_rows * io_bytes_per_row + 2 * wsz))


def _node_call(feat_cm, fp, tile):
    c_in, nn = feat_cm.shape
    out_sca = fp["n_ws"].shape[0]
    out_vec = fp["n_wg"].shape[0]
    c_out = out_sca + 3 * out_vec
    weights = [fp["n_wv1"], fp["n_ws"], fp["n_wv2"], fp["n_wg"], fp["n_bg"]]
    cost = _cost_estimate(nn, weights, 2 * (c_in + c_out), c_out)
    return pl.pallas_call(
        _node_kernel,
        grid=(nn // tile,),
        in_specs=[pl.BlockSpec((c_in, tile), lambda i: (0, i))]
                 + [_const_spec(w) for w in weights],
        out_specs=pl.BlockSpec((c_out, tile), lambda i: (0, i)),
        out_shape=jax.ShapeDtypeStruct((c_out, nn), ACT_DTYPE),
        compiler_params=pltpu.CompilerParams(dimension_semantics=("parallel",),
                                             vmem_limit_bytes=_VMEM_LIMIT),
        cost_estimate=cost,
    )(feat_cm, *weights)


def _edge_call(idx_row, node_tab, efeat_cm, fp, tile):
    c_e, ne = efeat_cm.shape
    out_vec, out_sca = fp["w_n2e"].shape
    c_node, nn_pad = node_tab.shape
    w_names = ["e_wv1", "e_ws", "e_wv2", "e_wg", "e_wd",
               "w_mix", "w_n2e", "w_evn",
               "o_wv1", "o_ws", "o_wv2", "o_wg", "bias_pack"]
    weights = [fp[n] for n in w_names]
    cost = _cost_estimate(ne, weights,
                          io_bytes_per_row=2 * c_e + 4 + 4 * (out_sca + 3 * out_vec),
                          transc_per_row=64,
                          extra_flops=2 * ne * nn_pad * c_node)
    return pl.pallas_call(
        _edge_kernel,
        grid=(ne // tile,),
        in_specs=[pl.BlockSpec((1, tile), lambda i: (0, i)),     # edge_index (tiled i32)
                  _const_spec(node_tab),                         # VMEM-resident node table
                  pl.BlockSpec((c_e, tile), lambda i: (0, i))]
                 + [_const_spec(w) for w in weights],
        out_specs=(pl.BlockSpec((out_sca, tile), lambda i: (0, i)),
                   pl.BlockSpec((3 * out_vec, tile), lambda i: (0, i))),
        out_shape=(jax.ShapeDtypeStruct((out_sca, ne), jnp.float32),
                   jax.ShapeDtypeStruct((3 * out_vec, ne), jnp.float32)),
        compiler_params=pltpu.CompilerParams(dimension_semantics=("parallel",),
                                             vmem_limit_bytes=_VMEM_LIMIT),
        cost_estimate=cost,
    )(idx_row, node_tab, efeat_cm, *weights)


@functools.partial(jax.jit, static_argnames=("tile_rows",))
def message_module_forward(node_sca, node_vec3, edge_sca, edge_vec3, edge_index,
                           fused_params, tile_rows=1024):
    """MessageModule forward (annealing=False path).

    node_sca: [Nn, node_sca] f32, node_vec3: [Nn, node_vec, 3] f32
    edge_sca: [Ne, edge_sca] f32, edge_vec3: [Ne, edge_vec, 3] f32
    edge_index: [Ne] int32.  Returns ([Ne, out_sca], [Ne, out_vec, 3]) f32.
    """
    n_nodes = node_sca.shape[0]
    n_edges = edge_sca.shape[0]
    out_vec_dim = fused_params["w_n2e"].shape[0]

    tile_n = _pick_tile(n_nodes, tile_rows)
    tile_e = _pick_tile(n_edges, tile_rows)
    nn_pad = _round_up(n_nodes, tile_n)
    ne_pad = _round_up(n_edges, tile_e)

    def to_cm(sca, vec3, m_pad):
        m, v = sca.shape[0], vec3.shape[1]
        flat = jnp.concatenate(
            [sca.T, jnp.transpose(vec3, (2, 1, 0)).reshape(3 * v, m)], axis=0)
        return jnp.pad(flat.astype(ACT_DTYPE), ((0, 0), (0, m_pad - m)))

    node_cm = to_cm(node_sca, node_vec3, nn_pad)
    edge_cm = to_cm(edge_sca, edge_vec3, ne_pad)
    idx_row = jnp.pad(edge_index.astype(jnp.int32), (0, ne_pad - n_edges)).reshape(1, ne_pad)

    # kernel 1: node GVLinear -> combined channel-major node table (bf16)
    node_tab = _node_call(node_cm, fused_params, tile_n)

    # kernel 2: fused gather + edge_gvp + mixing + out_gvlinear
    out_s_cm, out_v_cm = _edge_call(idx_row, node_tab, edge_cm, fused_params, tile_e)

    out_sca = out_s_cm[:, :n_edges].T
    out_vec = jnp.transpose(out_v_cm[:, :n_edges].reshape(3, out_vec_dim, n_edges), (2, 1, 0))
    return out_sca, out_vec


# --------------------------------------------------------------------------
# Parameters.  init_params keeps the torch.nn.Linear layout [out, in] (lin_scalar
# weights fused over concat([vector_norm, scalar])).  fuse_params builds the
# kernel-ready bf16 / block-diagonal / stacked forms once.
# --------------------------------------------------------------------------
def init_params(key, node_sca, node_vec, edge_sca, edge_vec, out_sca, out_vec):
    hid_sca, hid_vec = edge_sca, edge_vec
    hid_n = max(node_vec, out_vec)
    hid_e = max(edge_vec, hid_vec)
    hid_o = max(out_vec, out_vec)
    keys = iter(jax.random.split(key, 32))

    def w(out_d, in_d):
        return jax.random.uniform(next(keys), (out_d, in_d), jnp.float32, -1.0, 1.0) / (in_d ** 0.5)

    def b(out_d):
        return jax.random.uniform(next(keys), (out_d, 1), jnp.float32, -1.0, 1.0) * 0.1

    return {
        # node_gvlinear = GVLinear(node_sca, node_vec, out_sca, out_vec)
        "n_wv1": w(hid_n, node_vec), "n_ws": w(out_sca, hid_n + node_sca),
        "n_wv2": w(out_vec, hid_n), "n_wg": w(out_vec, out_sca), "n_bg": b(out_vec),
        # edge_gvp = GVPerceptronVN(edge_sca, edge_vec, hid_sca, hid_vec)
        "e_wv1": w(hid_e, edge_vec), "e_ws": w(hid_sca, hid_e + edge_sca),
        "e_wv2": w(hid_vec, hid_e), "e_wg": w(hid_vec, hid_sca), "e_bg": b(hid_vec),
        "e_wd": w(hid_vec, hid_vec),
        # message mixing linears
        "w_sca": w(out_sca, hid_sca), "b_sca": b(out_sca),
        "w_e2n": w(out_vec, hid_sca), "b_e2n": b(out_vec),
        "w_n2e": w(out_vec, out_sca), "b_n2e": b(out_vec),
        "w_evn": w(out_vec, hid_vec), "b_evn": b(out_vec),   # VNLinear default has bias
        # out_gvlinear = GVLinear(out_sca, out_vec, out_sca, out_vec)
        "o_wv1": w(hid_o, out_vec), "o_ws": w(out_sca, hid_o + out_sca),
        "o_wv2": w(out_vec, hid_o), "o_wg": w(out_vec, out_sca), "o_bg": b(out_vec),
    }


def fuse_params(p):
    """Build kernel-ready weights: bf16, block-diagonal VN weights, stacked mixing
    weights, packed bias vector (done once, outside the hot path)."""
    bf16 = jnp.bfloat16

    def bd(w):   # merge x/y/z matmuls: block-diagonal [3*out, 3*in]
        return jnp.kron(jnp.eye(3, dtype=w.dtype), w).astype(bf16)

    def bf(w):
        return w.astype(bf16)

    bias_pack = jnp.concatenate(
        [p["e_bg"], p["b_sca"], p["b_e2n"], p["b_n2e"],
         jnp.tile(p["b_evn"], (3, 1)), p["o_bg"]], axis=0).astype(jnp.float32)

    return {
        "n_wv1": bd(p["n_wv1"]), "n_ws": bf(p["n_ws"]), "n_wv2": bd(p["n_wv2"]),
        "n_wg": bf(p["n_wg"]), "n_bg": p["n_bg"].astype(jnp.float32),
        "e_wv1": bd(p["e_wv1"]), "e_ws": bf(p["e_ws"]), "e_wv2": bd(p["e_wv2"]),
        "e_wg": bf(p["e_wg"]), "e_wd": bd(p["e_wd"]),
        "w_mix": bf(jnp.concatenate([p["w_sca"], p["w_e2n"]], axis=0)),
        "w_n2e": bf(p["w_n2e"]), "w_evn": bd(p["w_evn"]),
        "o_wv1": bd(p["o_wv1"]), "o_ws": bf(p["o_ws"]), "o_wv2": bd(p["o_wv2"]),
        "o_wg": bf(p["o_wg"]),
        "bias_pack": bias_pack,
    }


# --------------------------------------------------------------------------
# Pure-JAX reference mirroring the PyTorch forward (native [M, C(,3)] layout).
# --------------------------------------------------------------------------
def reference_message_module(node_sca, node_vec3, edge_sca, edge_vec3, edge_index, p):
    def vnlinear(v3, w, b=None):
        out = jnp.einsum("mci,oc->moi", v3, w)
        return out if b is None else out + b.reshape(1, -1, 1)

    def gvlinear(sca, vec3, wv1, ws, wv2, wg, bg):
        inter = vnlinear(vec3, wv1)
        norm = jnp.sqrt(jnp.sum(inter * inter, axis=-1))
        out_sca = jnp.concatenate([norm, sca], axis=-1) @ ws.T
        out_vec = vnlinear(inter, wv2)
        gate = jax.nn.sigmoid(out_sca @ wg.T + bg.reshape(1, -1))
        return out_sca, gate[:, :, None] * out_vec

    def vn_leaky_relu(v3, wd, neg=NEG_SLOPE_VEC):
        d = vnlinear(v3, wd)
        dot = jnp.sum(v3 * d, axis=-1, keepdims=True)
        dns = jnp.sum(d * d, axis=-1, keepdims=True)
        mask = (dot >= 0).astype(v3.dtype)
        return neg * v3 + (1 - neg) * (mask * v3 + (1 - mask) * (v3 - dot / (dns + EPS) * d))

    ns, nv = gvlinear(node_sca, node_vec3, p["n_wv1"], p["n_ws"], p["n_wv2"], p["n_wg"], p["n_bg"])
    ns_e, nv_e = ns[edge_index], nv[edge_index]

    es, ev = gvlinear(edge_sca, edge_vec3, p["e_wv1"], p["e_ws"], p["e_wv2"], p["e_wg"], p["e_bg"])
    ev = vn_leaky_relu(ev, p["e_wd"])
    es = jnp.where(es >= 0, es, NEG_SLOPE_SCA * es)

    y_sca = ns_e * (es @ p["w_sca"].T + p["b_sca"].reshape(1, -1))
    g_e2n = es @ p["w_e2n"].T + p["b_e2n"].reshape(1, -1)
    g_n2e = ns_e @ p["w_n2e"].T + p["b_n2e"].reshape(1, -1)
    y_vec = (g_e2n[:, :, None] * nv_e
             + g_n2e[:, :, None] * vnlinear(ev, p["w_evn"], p["b_evn"]))

    return gvlinear(y_sca, y_vec, p["o_wv1"], p["o_ws"], p["o_wv2"], p["o_wg"], p["o_bg"])


# --------------------------------------------------------------------------
if __name__ == "__main__":
    NODE_SCA, NODE_VEC = 16, 8
    EDGE_SCA, EDGE_VEC = 16, 8
    OUT_SCA, OUT_VEC = 16, 8
    N_NODES, N_EDGES = 256, 512

    key = jax.random.PRNGKey(0)
    k1, k2, k3, k4, k5, kp = jax.random.split(key, 6)
    node_sca = jax.random.normal(k1, (N_NODES, NODE_SCA), jnp.float32)
    node_vec = jax.random.normal(k2, (N_NODES, NODE_VEC, 3), jnp.float32)
    edge_sca = jax.random.normal(k3, (N_EDGES, EDGE_SCA), jnp.float32)
    edge_vec = jax.random.normal(k4, (N_EDGES, EDGE_VEC, 3), jnp.float32)
    edge_index = jax.random.randint(k5, (N_EDGES,), 0, N_NODES, dtype=jnp.int32)

    params = init_params(kp, NODE_SCA, NODE_VEC, EDGE_SCA, EDGE_VEC, OUT_SCA, OUT_VEC)
    fused = fuse_params(params)

    # default tile_rows=1024; _pick_tile caps it so both row grids have >=2 steps here
    out_sca, out_vec = message_module_forward(node_sca, node_vec, edge_sca, edge_vec,
                                              edge_index, fused)
    jax.block_until_ready((out_sca, out_vec))

    # Reference on bf16-quantized primary inputs (kernel streams activations and
    # feeds bf16 operands to every dot, accumulating in f32).
    q = lambda x: x.astype(jnp.bfloat16).astype(jnp.float32)
    ref_sca, ref_vec = reference_message_module(q(node_sca), q(node_vec), q(edge_sca),
                                                q(edge_vec), edge_index, params)

    assert out_sca.shape == (N_EDGES, OUT_SCA)
    assert out_vec.shape == (N_EDGES, OUT_VEC, 3)
    err_s = float(jnp.max(jnp.abs(out_sca - ref_sca)))
    err_v = float(jnp.max(jnp.abs(out_vec - ref_vec)))
    assert jnp.allclose(out_sca, ref_sca, rtol=1e-1, atol=2e-2), err_s
    assert jnp.allclose(out_vec, ref_vec, rtol=1e-1, atol=2e-2), err_v

    print("KERNEL_OK")
</pallas_src>

<mosaic_0001>
module attributes {stable_mosaic.version = 11 : i64} {
  func.func @_node_kernel(%arg0: i32, %arg1: memref<40x128xbf16, #tpu.memory_space<vmem>>, %arg2: memref<24x24xbf16, #tpu.memory_space<vmem>>, %arg3: memref<16x24xbf16, #tpu.memory_space<vmem>>, %arg4: memref<24x24xbf16, #tpu.memory_space<vmem>>, %arg5: memref<8x16xbf16, #tpu.memory_space<vmem>>, %arg6: memref<8x1xf32, #tpu.memory_space<vmem>>, %arg7: memref<40x128xbf16, #tpu.memory_space<vmem>>) attributes {dimension_semantics = [#tpu.dimension_semantics<parallel>], iteration_bounds = array<i64: 2>, scalar_prefetch = 0 : i64, scratch_operands = 0 : i64, tpu.core_type = #tpu.core_type<tc>, window_params = [{transform_indices = @transform_0, window_bounds = array<i64: 40, 128>}, {pipeline_mode = #tpu.pipeline_mode<synchronous>, transform_indices = @transform_1, window_bounds = array<i64: 24, 24>}, {pipeline_mode = #tpu.pipeline_mode<synchronous>, transform_indices = @transform_2, window_bounds = array<i64: 16, 24>}, {pipeline_mode = #tpu.pipeline_mode<synchronous>, transform_indices = @transform_3, window_bounds = array<i64: 24, 24>}, {pipeline_mode = #tpu.pipeline_mode<synchronous>, transform_indices = @transform_4, window_bounds = array<i64: 8, 16>}, {pipeline_mode = #tpu.pipeline_mode<synchronous>, transform_indices = @transform_5, window_bounds = array<i64: 8, 1>}, {transform_indices = @transform_6, window_bounds = array<i64: 40, 128>}]} {
    %c0 = arith.constant 0 : index
    %c0_0 = arith.constant 0 : index
    %0 = vector.load %arg1[%c0, %c0_0] : memref<40x128xbf16, #tpu.memory_space<vmem>>, vector<40x128xbf16>
    %1 = vector.extract_strided_slice %0 {offsets = [0, 0], sizes = [16, 128], strides = [1, 1]} : vector<40x128xbf16> to vector<16x128xbf16>
    %2 = vector.extract_strided_slice %0 {offsets = [16, 0], sizes = [24, 128], strides = [1, 1]} : vector<40x128xbf16> to vector<24x128xbf16>
    %c0_1 = arith.constant 0 : index
    %c0_2 = arith.constant 0 : index
    %3 = vector.load %arg2[%c0_1, %c0_2] : memref<24x24xbf16, #tpu.memory_space<vmem>>, vector<24x24xbf16>
    %c0_3 = arith.constant 0 : index
    %c0_4 = arith.constant 0 : index
    %4 = vector.load %arg3[%c0_3, %c0_4] : memref<16x24xbf16, #tpu.memory_space<vmem>>, vector<16x24xbf16>
    %c0_5 = arith.constant 0 : index
    %c0_6 = arith.constant 0 : index
    %5 = vector.load %arg4[%c0_5, %c0_6] : memref<24x24xbf16, #tpu.memory_space<vmem>>, vector<24x24xbf16>
    %c0_7 = arith.constant 0 : index
    %c0_8 = arith.constant 0 : index
    %6 = vector.load %arg5[%c0_7, %c0_8] : memref<8x16xbf16, #tpu.memory_space<vmem>>, vector<8x16xbf16>
    %c0_9 = arith.constant 0 : index
    %c0_10 = arith.constant 0 : index
    %7 = vector.load %arg6[%c0_9, %c0_10] : memref<8x1xf32, #tpu.memory_space<vmem>>, vector<8x1xf32>
    %cst = arith.constant dense<0.000000e+00> : vector<24x128xf32>
    %8 = tpu.matmul %3, %2, %cst {dimension_numbers = #tpu.dot_dimension_numbers<[1], [0], [0], [1], [0, 0, 1, 1], [], []>} : vector<24x24xbf16>, vector<24x128xbf16>, vector<24x128xf32> -> vector<24x128xf32>
    %9 = vector.extract_strided_slice %8 {offsets = [0, 0], sizes = [8, 128], strides = [1, 1]} : vector<24x128xf32> to vector<8x128xf32>
    %10 = vector.extract_strided_slice %8 {offsets = [8, 0], sizes = [8, 128], strides = [1, 1]} : vector<24x128xf32> to vector<8x128xf32>
    %11 = vector.extract_strided_slice %8 {offsets = [16, 0], sizes = [8, 128], strides = [1, 1]} : vector<24x128xf32> to vector<8x128xf32>
    %12 = arith.mulf %9, %9 : vector<8x128xf32>
    %13 = arith.mulf %10, %10 : vector<8x128xf32>
    %14 = arith.addf %12, %13 : vector<8x128xf32>
    %15 = arith.mulf %11, %11 : vector<8x128xf32>
    %16 = arith.addf %14, %15 : vector<8x128xf32>
    %17 = math.sqrt %16 : vector<8x128xf32>
    %18 = arith.truncf %17 : vector<8x128xf32> to vector<8x128xbf16>
    %19 = tpu.concatenate %18, %1 in 0 : vector<8x128xbf16>, vector<16x128xbf16> -> vector<24x128xbf16>
    %cst_11 = arith.constant dense<0.000000e+00> : vector<16x128xf32>
    %20 = tpu.matmul %4, %19, %cst_11 {dimension_numbers = #tpu.dot_dimension_numbers<[1], [0], [0], [1], [0, 0, 1, 1], [], []>} : vector<16x24xbf16>, vector<24x128xbf16>, vector<16x128xf32> -> vector<16x128xf32>
    %21 = arith.truncf %20 : vector<16x128xf32> to vector<16x128xbf16>
    %cst_12 = arith.constant dense<0.000000e+00> : vector<8x128xf32>
    %22 = tpu.matmul %6, %21, %cst_12 {dimension_numbers = #tpu.dot_dimension_numbers<[1], [0], [0], [1], [0, 0, 1, 1], [], []>} : vector<8x16xbf16>, vector<16x128xbf16>, vector<8x128xf32> -> vector<8x128xf32>
    %23 = vector.broadcast %7 : vector<8x1xf32> to vector<8x128xf32>
    %24 = arith.addf %22, %23 : vector<8x128xf32>
    %25 = arith.negf %24 : vector<8x128xf32>
    %26 = math.exp %25 : vector<8x128xf32>
    %cst_13 = arith.constant 1.000000e+00 : f32
    %27 = vector.broadcast %cst_13 : f32 to vector<8x128xf32>
    %28 = arith.addf %27, %26 : vector<8x128xf32>
    %29 = arith.divf %27, %28 : vector<8x128xf32>
    %30 = arith.truncf %8 : vector<24x128xf32> to vector<24x128xbf16>
    %cst_14 = arith.constant dense<0.000000e+00> : vector<24x128xf32>
    %31 = tpu.matmul %5, %30, %cst_14 {dimension_numbers = #tpu.dot_dimension_numbers<[1], [0], [0], [1], [0, 0, 1, 1], [], []>} : vector<24x24xbf16>, vector<24x128xbf16>, vector<24x128xf32> -> vector<24x128xf32>
    %32 = tpu.concatenate %29, %29, %29 in 0 : vector<8x128xf32>, vector<8x128xf32>, vector<8x128xf32> -> vector<24x128xf32>
    %33 = arith.mulf %31, %32 : vector<24x128xf32>
    %34 = tpu.concatenate %20, %33 in 0 : vector<16x128xf32>, vector<24x128xf32> -> vector<40x128xf32>
    %35 = arith.truncf %34 : vector<40x128xf32> to vector<40x128xbf16>
    %c0_15 = arith.constant 0 : index
    %c0_16 = arith.constant 0 : index
    %36 = vector.load %arg7[%c0_15, %c0_16] : memref<40x128xbf16, #tpu.memory_space<vmem>>, vector<40x128xbf16>
    tpu.vector_store %arg7[%c0_15, %c0_16], %35 {strides = array<i32>} : memref<40x128xbf16, #tpu.memory_space<vmem>>, vector<40x128xbf16>,
    return
  }
  func.func @transform_0(%arg0: i32) -> (i32, i32) {
    %c0_i32 = arith.constant 0 : i32
    %c0_i32_0 = arith.constant 0 : i32
    return %c0_i32, %arg0 : i32, i32
  }
  func.func @transform_1(%arg0: i32) -> (i32, i32) {
    %c0_i32 = arith.constant 0 : i32
    %c0_i32_0 = arith.constant 0 : i32
    %c0_i32_1 = arith.constant 0 : i32
    return %c0_i32, %c0_i32_0 : i32, i32
  }
  func.func @transform_2(%arg0: i32) -> (i32, i32) {
    %c0_i32 = arith.constant 0 : i32
    %c0_i32_0 = arith.constant 0 : i32
    %c0_i32_1 = arith.constant 0 : i32
    return %c0_i32, %c0_i32_0 : i32, i32
  }
  func.func @transform_3(%arg0: i32) -> (i32, i32) {
    %c0_i32 = arith.constant 0 : i32
    %c0_i32_0 = arith.constant 0 : i32
    %c0_i32_1 = arith.constant 0 : i32
    return %c0_i32, %c0_i32_0 : i32, i32
  }
  func.func @transform_4(%arg0: i32) -> (i32, i32) {
    %c0_i32 = arith.constant 0 : i32
    %c0_i32_0 = arith.constant 0 : i32
    %c0_i32_1 = arith.constant 0 : i32
    return %c0_i32, %c0_i32_0 : i32, i32
  }
  func.func @transform_5(%arg0: i32) -> (i32, i32) {
    %c0_i32 = arith.constant 0 : i32
    %c0_i32_0 = arith.constant 0 : i32
    %c0_i32_1 = arith.constant 0 : i32
    return %c0_i32, %c0_i32_0 : i32, i32
  }
  func.func @transform_6(%arg0: i32) -> (i32, i32) {
    %c0_i32 = arith.constant 0 : i32
    %c0_i32_0 = arith.constant 0 : i32
    return %c0_i32, %arg0 : i32, i32
  }
}

module attributes {stable_mosaic.version = 11 : i64} {
  func.func @_edge_kernel(%arg0: i32, %arg1: memref<1x256xi32, #tpu.memory_space<vmem>>, %arg2: memref<40x256xbf16, #tpu.memory_space<vmem>>, %arg3: memref<40x256xbf16, #tpu.memory_space<vmem>>, %arg4: memref<24x24xbf16, #tpu.memory_space<vmem>>, %arg5: memref<16x24xbf16, #tpu.memory_space<vmem>>, %arg6: memref<24x24xbf16, #tpu.memory_space<vmem>>, %arg7: memref<8x16xbf16, #tpu.memory_space<vmem>>, %arg8: memref<24x24xbf16, #tpu.memory_space<vmem>>, %arg9: memref<24x16xbf16, #tpu.memory_space<vmem>>, %arg10: memref<8x16xbf16, #tpu.memory_space<vmem>>, %arg11: memref<24x24xbf16, #tpu.memory_space<vmem>>, %arg12: memref<24x24xbf16, #tpu.memory_space<vmem>>, %arg13: memref<16x24xbf16, #tpu.memory_space<vmem>>, %arg14: memref<24x24xbf16, #tpu.memory_space<vmem>>, %arg15: memref<8x16xbf16, #tpu.memory_space<vmem>>, %arg16: memref<72x1xf32, #tpu.memory_space<vmem>>, %arg17: memref<16x256xf32, #tpu.memory_space<vmem>>, %arg18: memref<24x256xf32, #tpu.memory_space<vmem>>) attributes {dimension_semantics = [#tpu.dimension_semantics<parallel>], iteration_bounds = array<i64: 2>, scalar_prefetch = 0 : i64, scratch_operands = 0 : i64, tpu.core_type = #tpu.core_type<tc>, window_params = [{transform_indices = @transform_0, window_bounds = array<i64: 1, 256>}, {pipeline_mode = #tpu.pipeline_mode<synchronous>, transform_indices = @transform_1, window_bounds = array<i64: 40, 256>}, {transform_indices = @transform_2, window_bounds = array<i64: 40, 256>}, {pipeline_mode = #tpu.pipeline_mode<synchronous>, transform_indices = @transform_3, window_bounds = array<i64: 24, 24>}, {pipeline_mode = #tpu.pipeline_mode<synchronous>, transform_indices = @transform_4, window_bounds = array<i64: 16, 24>}, {pipeline_mode = #tpu.pipeline_mode<synchronous>, transform_indices = @transform_5, window_bounds = array<i64: 24, 24>}, {pipeline_mode = #tpu.pipeline_mode<synchronous>, transform_indices = @transform_6, window_bounds = array<i64: 8, 16>}, {pipeline_mode = #tpu.pipeline_mode<synchronous>, transform_indices = @transform_7, window_bounds = array<i64: 24, 24>}, {pipeline_mode = #tpu.pipeline_mode<synchronous>, transform_indices = @transform_8, window_bounds = array<i64: 24, 16>}, {pipeline_mode = #tpu.pipeline_mode<synchronous>, transform_indices = @transform_9, window_bounds = array<i64: 8, 16>}, {pipeline_mode = #tpu.pipeline_mode<synchronous>, transform_indices = @transform_10, window_bounds = array<i64: 24, 24>}, {pipeline_mode = #tpu.pipeline_mode<synchronous>, transform_indices = @transform_11, window_bounds = array<i64: 24, 24>}, {pipeline_mode = #tpu.pipeline_mode<synchronous>, transform_indices = @transform_12, window_bounds = array<i64: 16, 24>}, {pipeline_mode = #tpu.pipeline_mode<synchronous>, transform_indices = @transform_13, window_bounds = array<i64: 24, 24>}, {pipeline_mode = #tpu.pipeline_mode<synchronous>, transform_indices = @transform_14, window_bounds = array<i64: 8, 16>}, {pipeline_mode = #tpu.pipeline_mode<synchronous>, transform_indices = @transform_15, window_bounds = array<i64: 72, 1>}, {transform_indices = @transform_16, window_bounds = array<i64: 16, 256>}, {transform_indices = @transform_17, window_bounds = array<i64: 24, 256>}]} {
    %c0 = arith.constant 0 : index
    %c0_0 = arith.constant 0 : index
    %0 = vector.load %arg16[%c0, %c0_0] : memref<72x1xf32, #tpu.memory_space<vmem>>, vector<72x1xf32>
    %1 = vector.extract_strided_slice %0 {offsets = [0, 0], sizes = [8, 1], strides = [1, 1]} : vector<72x1xf32> to vector<8x1xf32>
    %2 = vector.extract_strided_slice %0 {offsets = [8, 0], sizes = [24, 1], strides = [1, 1]} : vector<72x1xf32> to vector<24x1xf32>
    %3 = vector.extract_strided_slice %0 {offsets = [32, 0], sizes = [8, 1], strides = [1, 1]} : vector<72x1xf32> to vector<8x1xf32>
    %4 = vector.extract_strided_slice %0 {offsets = [40, 0], sizes = [24, 1], strides = [1, 1]} : vector<72x1xf32> to vector<24x1xf32>
    %5 = vector.extract_strided_slice %0 {offsets = [64, 0], sizes = [8, 1], strides = [1, 1]} : vector<72x1xf32> to vector<8x1xf32>
    %c0_1 = arith.constant 0 : index
    %c0_2 = arith.constant 0 : index
    %6 = vector.load %arg1[%c0_1, %c0_2] : memref<1x256xi32, #tpu.memory_space<vmem>>, vector<1x256xi32>
    %7 = tpu.iota {dimensions = array<i32: 0>} : vector<256x256xi32>
    %8 = vector.broadcast %6 : vector<1x256xi32> to vector<256x256xi32>
    %9 = arith.cmpi eq, %7, %8 : vector<256x256xi32>
    %10 = arith.extui %9 : vector<256x256xi1> to vector<256x256xi32>
    %11 = arith.sitofp %10 : vector<256x256xi32> to vector<256x256xf32>
    %12 = arith.truncf %11 : vector<256x256xf32> to vector<256x256xbf16>
    %c0_3 = arith.constant 0 : index
    %c0_4 = arith.constant 0 : index
    %13 = vector.load %arg2[%c0_3, %c0_4] : memref<40x256xbf16, #tpu.memory_space<vmem>>, vector<40x256xbf16>
    %cst = arith.constant dense<0.000000e+00> : vector<40x256xf32>
    %14 = tpu.matmul %13, %12, %cst {dimension_numbers = #tpu.dot_dimension_numbers<[1], [0], [0], [1], [0, 0, 1, 1], [], []>} : vector<40x256xbf16>, vector<256x256xbf16>, vector<40x256xf32> -> vector<40x256xf32>
    %15 = vector.extract_strided_slice %14 {offsets = [0, 0], sizes = [16, 256], strides = [1, 1]} : vector<40x256xf32> to vector<16x256xf32>
    %16 = vector.extract_strided_slice %14 {offsets = [16, 0], sizes = [8, 256], strides = [1, 1]} : vector<40x256xf32> to vector<8x256xf32>
    %17 = vector.extract_strided_slice %14 {offsets = [24, 0], sizes = [8, 256], strides = [1, 1]} : vector<40x256xf32> to vector<8x256xf32>
    %18 = vector.extract_strided_slice %14 {offsets = [32, 0], sizes = [8, 256], strides = [1, 1]} : vector<40x256xf32> to vector<8x256xf32>
    %c0_5 = arith.constant 0 : index
    %c0_6 = arith.constant 0 : index
    %19 = vector.load %arg3[%c0_5, %c0_6] : memref<40x256xbf16, #tpu.memory_space<vmem>>, vector<40x256xbf16>
    %20 = vector.extract_strided_slice %19 {offsets = [0, 0], sizes = [16, 256], strides = [1, 1]} : vector<40x256xbf16> to vector<16x256xbf16>
    %21 = vector.extract_strided_slice %19 {offsets = [16, 0], sizes = [24, 256], strides = [1, 1]} : vector<40x256xbf16> to vector<24x256xbf16>
    %c0_7 = arith.constant 0 : index
    %c0_8 = arith.constant 0 : index
    %22 = vector.load %arg4[%c0_7, %c0_8] : memref<24x24xbf16, #tpu.memory_space<vmem>>, vector<24x24xbf16>
    %c0_9 = arith.constant 0 : index
    %c0_10 = arith.constant 0 : index
    %23 = vector.load %arg5[%c0_9, %c0_10] : memref<16x24xbf16, #tpu.memory_space<vmem>>, vector<16x24xbf16>
    %c0_11 = arith.constant 0 : index
    %c0_12 = arith.constant 0 : index
    %24 = vector.load %arg6[%c0_11, %c0_12] : memref<24x24xbf16, #tpu.memory_space<vmem>>, vector<24x24xbf16>
    %c0_13 = arith.constant 0 : index
    %c0_14 = arith.constant 0 : index
    %25 = vector.load %arg7[%c0_13, %c0_14] : memref<8x16xbf16, #tpu.memory_space<vmem>>, vector<8x16xbf16>
    %cst_15 = arith.constant dense<0.000000e+00> : vector<24x256xf32>
    %26 = tpu.matmul %22, %21, %cst_15 {dimension_numbers = #tpu.dot_dimension_numbers<[1], [0], [0], [1], [0, 0, 1, 1], [], []>} : vector<24x24xbf16>, vector<24x256xbf16>, vector<24x256xf32> -> vector<24x256xf32>
    %27 = vector.extract_strided_slice %26 {offsets = [0, 0], sizes = [8, 256], strides = [1, 1]} : vector<24x256xf32> to vector<8x256xf32>
    %28 = vector.extract_strided_slice %26 {offsets = [8, 0], sizes = [8, 256], strides = [1, 1]} : vector<24x256xf32> to vector<8x256xf32>
    %29 = vector.extract_strided_slice %26 {offsets = [16, 0], sizes = [8, 256], strides = [1, 1]} : vector<24x256xf32> to vector<8x256xf32>
    %30 = arith.mulf %27, %27 : vector<8x256xf32>
    %31 = arith.mulf %28, %28 : vector<8x256xf32>
    %32 = arith.addf %30, %31 : vector<8x256xf32>
    %33 = arith.mulf %29, %29 : vector<8x256xf32>
    %34 = arith.addf %32, %33 : vector<8x256xf32>
    %35 = math.sqrt %34 : vector<8x256xf32>
    %36 = arith.truncf %35 : vector<8x256xf32> to vector<8x256xbf16>
    %37 = tpu.concatenate %36, %20 in 0 : vector<8x256xbf16>, vector<16x256xbf16> -> vector<24x256xbf16>
    %cst_16 = arith.constant dense<0.000000e+00> : vector<16x256xf32>
    %38 = tpu.matmul %23, %37, %cst_16 {dimension_numbers = #tpu.dot_dimension_numbers<[1], [0], [0], [1], [0, 0, 1, 1], [], []>} : vector<16x24xbf16>, vector<24x256xbf16>, vector<16x256xf32> -> vector<16x256xf32>
    %39 = arith.truncf %38 : vector<16x256xf32> to vector<16x256xbf16>
    %cst_17 = arith.constant dense<0.000000e+00> : vector<8x256xf32>
    %40 = tpu.matmul %25, %39, %cst_17 {dimension_numbers = #tpu.dot_dimension_numbers<[1], [0], [0], [1], [0, 0, 1, 1], [], []>} : vector<8x16xbf16>, vector<16x256xbf16>, vector<8x256xf32> -> vector<8x256xf32>
    %41 = vector.broadcast %1 : vector<8x1xf32> to vector<8x256xf32>
    %42 = arith.addf %40, %41 : vector<8x256xf32>
    %43 = arith.negf %42 : vector<8x256xf32>
    %44 = math.exp %43 : vector<8x256xf32>
    %cst_18 = arith.constant 1.000000e+00 : f32
    %45 = vector.broadcast %cst_18 : f32 to vector<8x256xf32>
    %46 = arith.addf %45, %44 : vector<8x256xf32>
    %47 = arith.divf %45, %46 : vector<8x256xf32>
    %48 = arith.truncf %26 : vector<24x256xf32> to vector<24x256xbf16>
    %cst_19 = arith.constant dense<0.000000e+00> : vector<24x256xf32>
    %49 = tpu.matmul %24, %48, %cst_19 {dimension_numbers = #tpu.dot_dimension_numbers<[1], [0], [0], [1], [0, 0, 1, 1], [], []>} : vector<24x24xbf16>, vector<24x256xbf16>, vector<24x256xf32> -> vector<24x256xf32>
    %50 = tpu.concatenate %47, %47, %47 in 0 : vector<8x256xf32>, vector<8x256xf32>, vector<8x256xf32> -> vector<24x256xf32>
    %51 = arith.mulf %49, %50 : vector<24x256xf32>
    %c0_20 = arith.constant 0 : index
    %c0_21 = arith.constant 0 : index
    %52 = vector.load %arg8[%c0_20, %c0_21] : memref<24x24xbf16, #tpu.memory_space<vmem>>, vector<24x24xbf16>
    %53 = arith.truncf %51 : vector<24x256xf32> to vector<24x256xbf16>
    %cst_22 = arith.constant dense<0.000000e+00> : vector<24x256xf32>
    %54 = tpu.matmul %52, %53, %cst_22 {dimension_numbers = #tpu.dot_dimension_numbers<[1], [0], [0], [1], [0, 0, 1, 1], [], []>} : vector<24x24xbf16>, vector<24x256xbf16>, vector<24x256xf32> -> vector<24x256xf32>
    %55 = vector.extract_strided_slice %51 {offsets = [0, 0], sizes = [8, 256], strides = [1, 1]} : vector<24x256xf32> to vector<8x256xf32>
    %56 = vector.extract_strided_slice %51 {offsets = [8, 0], sizes = [8, 256], strides = [1, 1]} : vector<24x256xf32> to vector<8x256xf32>
    %57 = vector.extract_strided_slice %51 {offsets = [16, 0], sizes = [8, 256], strides = [1, 1]} : vector<24x256xf32> to vector<8x256xf32>
    %58 = vector.extract_strided_slice %54 {offsets = [0, 0], sizes = [8, 256], strides = [1, 1]} : vector<24x256xf32> to vector<8x256xf32>
    %59 = vector.extract_strided_slice %54 {offsets = [8, 0], sizes = [8, 256], strides = [1, 1]} : vector<24x256xf32> to vector<8x256xf32>
    %60 = vector.extract_strided_slice %54 {offsets = [16, 0], sizes = [8, 256], strides = [1, 1]} : vector<24x256xf32> to vector<8x256xf32>
    %61 = arith.mulf %55, %58 : vector<8x256xf32>
    %62 = arith.mulf %56, %59 : vector<8x256xf32>
    %63 = arith.addf %61, %62 : vector<8x256xf32>
    %64 = arith.mulf %57, %60 : vector<8x256xf32>
    %65 = arith.addf %63, %64 : vector<8x256xf32>
    %66 = arith.mulf %58, %58 : vector<8x256xf32>
    %67 = arith.mulf %59, %59 : vector<8x256xf32>
    %68 = arith.addf %66, %67 : vector<8x256xf32>
    %69 = arith.mulf %60, %60 : vector<8x256xf32>
    %70 = arith.addf %68, %69 : vector<8x256xf32>
    %cst_23 = arith.constant 9.99999997E-7 : f32
    %71 = vector.broadcast %cst_23 : f32 to vector<8x256xf32>
    %72 = arith.addf %70, %71 : vector<8x256xf32>
    %73 = tpu.reciprocal %72 {approx = true} : vector<8x256xf32> -> vector<8x256xf32>
    %74 = arith.mulf %65, %73 : vector<8x256xf32>
    %cst_24 = arith.constant 0.000000e+00 : f32
    %75 = vector.broadcast %cst_24 : f32 to vector<8x256xf32>
    %76 = arith.cmpf oge, %65, %75 : vector<8x256xf32>
    %cst_25 = arith.constant 0.00999999977 : f32
    %77 = vector.broadcast %cst_25 : f32 to vector<8x256xf32>
    %78 = arith.mulf %77, %55 : vector<8x256xf32>
    %79 = arith.mulf %74, %58 : vector<8x256xf32>
    %80 = arith.subf %55, %79 : vector<8x256xf32>
    %81 = arith.select %76, %55, %80 : vector<8x256xi1>, vector<8x256xf32>
    %cst_26 = arith.constant 9.900000e-01 : f32
    %82 = vector.broadcast %cst_26 : f32 to vector<8x256xf32>
    %83 = arith.mulf %82, %81 : vector<8x256xf32>
    %84 = arith.addf %78, %83 : vector<8x256xf32>
    %cst_27 = arith.constant 0.00999999977 : f32
    %85 = vector.broadcast %cst_27 : f32 to vector<8x256xf32>
    %86 = arith.mulf %85, %56 : vector<8x256xf32>
    %87 = arith.mulf %74, %59 : vector<8x256xf32>
    %88 = arith.subf %56, %87 : vector<8x256xf32>
    %89 = arith.select %76, %56, %88 : vector<8x256xi1>, vector<8x256xf32>
    %cst_28 = arith.constant 9.900000e-01 : f32
    %90 = vector.broadcast %cst_28 : f32 to vector<8x256xf32>
    %91 = arith.mulf %90, %89 : vector<8x256xf32>
    %92 = arith.addf %86, %91 : vector<8x256xf32>
    %cst_29 = arith.constant 0.00999999977 : f32
    %93 = vector.broadcast %cst_29 : f32 to vector<8x256xf32>
    %94 = arith.mulf %93, %57 : vector<8x256xf32>
    %95 = arith.mulf %74, %60 : vector<8x256xf32>
    %96 = arith.subf %57, %95 : vector<8x256xf32>
    %97 = arith.select %76, %57, %96 : vector<8x256xi1>, vector<8x256xf32>
    %cst_30 = arith.constant 9.900000e-01 : f32
    %98 = vector.broadcast %cst_30 : f32 to vector<8x256xf32>
    %99 = arith.mulf %98, %97 : vector<8x256xf32>
    %100 = arith.addf %94, %99 : vector<8x256xf32>
    %101 = tpu.concatenate %84, %92, %100 in 0 : vector<8x256xf32>, vector<8x256xf32>, vector<8x256xf32> -> vector<24x256xf32>
    %cst_31 = arith.constant 0.000000e+00 : f32
    %102 = vector.broadcast %cst_31 : f32 to vector<16x256xf32>
    %103 = arith.cmpf oge, %38, %102 : vector<16x256xf32>
    %cst_32 = arith.constant 0.00999999977 : f32
    %104 = vector.broadcast %cst_32 : f32 to vector<16x256xf32>
    %105 = arith.mulf %104, %38 : vector<16x256xf32>
    %106 = arith.select %103, %38, %105 : vector<16x256xi1>, vector<16x256xf32>
    %c0_33 = arith.constant 0 : index
    %c0_34 = arith.constant 0 : index
    %107 = vector.load %arg9[%c0_33, %c0_34] : memref<24x16xbf16, #tpu.memory_space<vmem>>, vector<24x16xbf16>
    %108 = arith.truncf %106 : vector<16x256xf32> to vector<16x256xbf16>
    %cst_35 = arith.constant dense<0.000000e+00> : vector<24x256xf32>
    %109 = tpu.matmul %107, %108, %cst_35 {dimension_numbers = #tpu.dot_dimension_numbers<[1], [0], [0], [1], [0, 0, 1, 1], [], []>} : vector<24x16xbf16>, vector<16x256xbf16>, vector<24x256xf32> -> vector<24x256xf32>
    %110 = vector.broadcast %2 : vector<24x1xf32> to vector<24x256xf32>
    %111 = arith.addf %109, %110 : vector<24x256xf32>
    %112 = vector.extract_strided_slice %111 {offsets = [0, 0], sizes = [16, 256], strides = [1, 1]} : vector<24x256xf32> to vector<16x256xf32>
    %113 = arith.mulf %15, %112 : vector<16x256xf32>
    %114 = vector.extract_strided_slice %111 {offsets = [16, 0], sizes = [8, 256], strides = [1, 1]} : vector<24x256xf32> to vector<8x256xf32>
    %c0_36 = arith.constant 0 : index
    %c0_37 = arith.constant 0 : index
    %115 = vector.load %arg10[%c0_36, %c0_37] : memref<8x16xbf16, #tpu.memory_space<vmem>>, vector<8x16xbf16>
    %116 = arith.truncf %15 : vector<16x256xf32> to vector<16x256xbf16>
    %cst_38 = arith.constant dense<0.000000e+00> : vector<8x256xf32>
    %117 = tpu.matmul %115, %116, %cst_38 {dimension_numbers = #tpu.dot_dimension_numbers<[1], [0], [0], [1], [0, 0, 1, 1], [], []>} : vector<8x16xbf16>, vector<16x256xbf16>, vector<8x256xf32> -> vector<8x256xf32>
    %118 = vector.broadcast %3 : vector<8x1xf32> to vector<8x256xf32>
    %119 = arith.addf %117, %118 : vector<8x256xf32>
    %c0_39 = arith.constant 0 : index
    %c0_40 = arith.constant 0 : index
    %120 = vector.load %arg11[%c0_39, %c0_40] : memref<24x24xbf16, #tpu.memory_space<vmem>>, vector<24x24xbf16>
    %121 = arith.truncf %101 : vector<24x256xf32> to vector<24x256xbf16>
    %cst_41 = arith.constant dense<0.000000e+00> : vector<24x256xf32>
    %122 = tpu.matmul %120, %121, %cst_41 {dimension_numbers = #tpu.dot_dimension_numbers<[1], [0], [0], [1], [0, 0, 1, 1], [], []>} : vector<24x24xbf16>, vector<24x256xbf16>, vector<24x256xf32> -> vector<24x256xf32>
    %123 = vector.broadcast %4 : vector<24x1xf32> to vector<24x256xf32>
    %124 = arith.addf %122, %123 : vector<24x256xf32>
    %125 = arith.mulf %114, %16 : vector<8x256xf32>
    %126 = vector.extract_strided_slice %124 {offsets = [0, 0], sizes = [8, 256], strides = [1, 1]} : vector<24x256xf32> to vector<8x256xf32>
    %127 = arith.mulf %119, %126 : vector<8x256xf32>
    %128 = arith.addf %125, %127 : vector<8x256xf32>
    %129 = arith.mulf %114, %17 : vector<8x256xf32>
    %130 = vector.extract_strided_slice %124 {offsets = [8, 0], sizes = [8, 256], strides = [1, 1]} : vector<24x256xf32> to vector<8x256xf32>
    %131 = arith.mulf %119, %130 : vector<8x256xf32>
    %132 = arith.addf %129, %131 : vector<8x256xf32>
    %133 = arith.mulf %114, %18 : vector<8x256xf32>
    %134 = vector.extract_strided_slice %124 {offsets = [16, 0], sizes = [8, 256], strides = [1, 1]} : vector<24x256xf32> to vector<8x256xf32>
    %135 = arith.mulf %119, %134 : vector<8x256xf32>
    %136 = arith.addf %133, %135 : vector<8x256xf32>
    %137 = tpu.concatenate %128, %132, %136 in 0 : vector<8x256xf32>, vector<8x256xf32>, vector<8x256xf32> -> vector<24x256xf32>
    %138 = arith.truncf %113 : vector<16x256xf32> to vector<16x256xbf16>
    %139 = arith.truncf %137 : vector<24x256xf32> to vector<24x256xbf16>
    %c0_42 = arith.constant 0 : index
    %c0_43 = arith.constant 0 : index
    %140 = vector.load %arg12[%c0_42, %c0_43] : memref<24x24xbf16, #tpu.memory_space<vmem>>, vector<24x24xbf16>
    %c0_44 = arith.constant 0 : index
    %c0_45 = arith.constant 0 : index
    %141 = vector.load %arg13[%c0_44, %c0_45] : memref<16x24xbf16, #tpu.memory_space<vmem>>, vector<16x24xbf16>
    %c0_46 = arith.constant 0 : index
    %c0_47 = arith.constant 0 : index
    %142 = vector.load %arg14[%c0_46, %c0_47] : memref<24x24xbf16, #tpu.memory_space<vmem>>, vector<24x24xbf16>
    %c0_48 = arith.constant 0 : index
    %c0_49 = arith.constant 0 : index
    %143 = vector.load %arg15[%c0_48, %c0_49] : memref<8x16xbf16, #tpu.memory_space<vmem>>, vector<8x16xbf16>
    %cst_50 = arith.constant dense<0.000000e+00> : vector<24x256xf32>
    %144 = tpu.matmul %140, %139, %cst_50 {dimension_numbers = #tpu.dot_dimension_numbers<[1], [0], [0], [1], [0, 0, 1, 1], [], []>} : vector<24x24xbf16>, vector<24x256xbf16>, vector<24x256xf32> -> vector<24x256xf32>
    %145 = vector.extract_strided_slice %144 {offsets = [0, 0], sizes = [8, 256], strides = [1, 1]} : vector<24x256xf32> to vector<8x256xf32>
    %146 = vector.extract_strided_slice %144 {offsets = [8, 0], sizes = [8, 256], strides = [1, 1]} : vector<24x256xf32> to vector<8x256xf32>
    %147 = vector.extract_strided_slice %144 {offsets = [16, 0], sizes = [8, 256], strides = [1, 1]} : vector<24x256xf32> to vector<8x256xf32>
    %148 = arith.mulf %145, %145 : vector<8x256xf32>
    %149 = arith.mulf %146, %146 : vector<8x256xf32>
    %150 = arith.addf %148, %149 : vector<8x256xf32>
    %151 = arith.mulf %147, %147 : vector<8x256xf32>
    %152 = arith.addf %150, %151 : vector<8x256xf32>
    %153 = math.sqrt %152 : vector<8x256xf32>
    %154 = arith.truncf %153 : vector<8x256xf32> to vector<8x256xbf16>
    %155 = tpu.concatenate %154, %138 in 0 : vector<8x256xbf16>, vector<16x256xbf16> -> vector<24x256xbf16>
    %cst_51 = arith.constant dense<0.000000e+00> : vector<16x256xf32>
    %156 = tpu.matmul %141, %155, %cst_51 {dimension_numbers = #tpu.dot_dimension_numbers<[1], [0], [0], [1], [0, 0, 1, 1], [], []>} : vector<16x24xbf16>, vector<24x256xbf16>, vector<16x256xf32> -> vector<16x256xf32>
    %157 = arith.truncf %156 : vector<16x256xf32> to vector<16x256xbf16>
    %cst_52 = arith.constant dense<0.000000e+00> : vector<8x256xf32>
    %158 = tpu.matmul %143, %157, %cst_52 {dimension_numbers = #tpu.dot_dimension_numbers<[1], [0], [0], [1], [0, 0, 1, 1], [], []>} : vector<8x16xbf16>, vector<16x256xbf16>, vector<8x256xf32> -> vector<8x256xf32>
    %159 = vector.broadcast %5 : vector<8x1xf32> to vector<8x256xf32>
    %160 = arith.addf %158, %159 : vector<8x256xf32>
    %161 = arith.negf %160 : vector<8x256xf32>
    %162 = math.exp %161 : vector<8x256xf32>
    %cst_53 = arith.constant 1.000000e+00 : f32
    %163 = vector.broadcast %cst_53 : f32 to vector<8x256xf32>
    %164 = arith.addf %163, %162 : vector<8x256xf32>
    %165 = arith.divf %163, %164 : vector<8x256xf32>
    %166 = arith.truncf %144 : vector<24x256xf32> to vector<24x256xbf16>
    %cst_54 = arith.constant dense<0.000000e+00> : vector<24x256xf32>
    %167 = tpu.matmul %142, %166, %cst_54 {dimension_numbers = #tpu.dot_dimension_numbers<[1], [0], [0], [1], [0, 0, 1, 1], [], []>} : vector<24x24xbf16>, vector<24x256xbf16>, vector<24x256xf32> -> vector<24x256xf32>
    %168 = tpu.concatenate %165, %165, %165 in 0 : vector<8x256xf32>, vector<8x256xf32>, vector<8x256xf32> -> vector<24x256xf32>
    %169 = arith.mulf %167, %168 : vector<24x256xf32>
    %c0_55 = arith.constant 0 : index
    %c0_56 = arith.constant 0 : index
    %170 = vector.load %arg17[%c0_55, %c0_56] : memref<16x256xf32, #tpu.memory_space<vmem>>, vector<16x256xf32>
    tpu.vector_store %arg17[%c0_55, %c0_56], %156 {strides = array<i32>} : memref<16x256xf32, #tpu.memory_space<vmem>>, vector<16x256xf32>,
    %c0_57 = arith.constant 0 : index
    %c0_58 = arith.constant 0 : index
    %171 = vector.load %arg18[%c0_57, %c0_58] : memref<24x256xf32, #tpu.memory_space<vmem>>, vector<24x256xf32>
    tpu.vector_store %arg18[%c0_57, %c0_58], %169 {strides = array<i32>} : memref<24x256xf32, #tpu.memory_space<vmem>>, vector<24x256xf32>,
    return
  }
  func.func @transform_0(%arg0: i32) -> (i32, i32) {
    %c0_i32 = arith.constant 0 : i32
    %c0_i32_0 = arith.constant 0 : i32
    return %c0_i32, %arg0 : i32, i32
  }
  func.func @transform_1(%arg0: i32) -> (i32, i32) {
    %c0_i32 = arith.constant 0 : i32
    %c0_i32_0 = arith.constant 0 : i32
    %c0_i32_1 = arith.constant 0 : i32
    return %c0_i32, %c0_i32_0 : i32, i32
  }
  func.func @transform_2(%arg0: i32) -> (i32, i32) {
    %c0_i32 = arith.constant 0 : i32
    %c0_i32_0 = arith.constant 0 : i32
    return %c0_i32, %arg0 : i32, i32
  }
  func.func @transform_3(%arg0: i32) -> (i32, i32) {
    %c0_i32 = arith.constant 0 : i32
    %c0_i32_0 = arith.constant 0 : i32
    %c0_i32_1 = arith.constant 0 : i32
    return %c0_i32, %c0_i32_0 : i32, i32
  }
  func.func @transform_4(%arg0: i32) -> (i32, i32) {
    %c0_i32 = arith.constant 0 : i32
    %c0_i32_0 = arith.constant 0 : i32
    %c0_i32_1 = arith.constant 0 : i32
    return %c0_i32, %c0_i32_0 : i32, i32
  }
  func.func @transform_5(%arg0: i32) -> (i32, i32) {
    %c0_i32 = arith.constant 0 : i32
    %c0_i32_0 = arith.constant 0 : i32
    %c0_i32_1 = arith.constant 0 : i32
    return %c0_i32, %c0_i32_0 : i32, i32
  }
  func.func @transform_6(%arg0: i32) -> (i32, i32) {
    %c0_i32 = arith.constant 0 : i32
    %c0_i32_0 = arith.constant 0 : i32
    %c0_i32_1 = arith.constant 0 : i32
    return %c0_i32, %c0_i32_0 : i32, i32
  }
  func.func @transform_7(%arg0: i32) -> (i32, i32) {
    %c0_i32 = arith.constant 0 : i32
    %c0_i32_0 = arith.constant 0 : i32
    %c0_i32_1 = arith.constant 0 : i32
    return %c0_i32, %c0_i32_0 : i32, i32
  }
  func.func @transform_8(%arg0: i32) -> (i32, i32) {
    %c0_i32 = arith.constant 0 : i32
    %c0_i32_0 = arith.constant 0 : i32
    %c0_i32_1 = arith.constant 0 : i32
    return %c0_i32, %c0_i32_0 : i32, i32
  }
  func.func @transform_9(%arg0: i32) -> (i32, i32) {
    %c0_i32 = arith.constant 0 : i32
    %c0_i32_0 = arith.constant 0 : i32
    %c0_i32_1 = arith.constant 0 : i32
    return %c0_i32, %c0_i32_0 : i32, i32
  }
  func.func @transform_10(%arg0: i32) -> (i32, i32) {
    %c0_i32 = arith.constant 0 : i32
    %c0_i32_0 = arith.constant 0 : i32
    %c0_i32_1 = arith.constant 0 : i32
    return %c0_i32, %c0_i32_0 : i32, i32
  }
  func.func @transform_11(%arg0: i32) -> (i32, i32) {
    %c0_i32 = arith.constant 0 : i32
    %c0_i32_0 = arith.constant 0 : i32
    %c0_i32_1 = arith.constant 0 : i32
    return %c0_i32, %c0_i32_0 : i32, i32
  }
  func.func @transform_12(%arg0: i32) -> (i32, i32) {
    %c0_i32 = arith.constant 0 : i32
    %c0_i32_0 = arith.constant 0 : i32
    %c0_i32_1 = arith.constant 0 : i32
    return %c0_i32, %c0_i32_0 : i32, i32
  }
  func.func @transform_13(%arg0: i32) -> (i32, i32) {
    %c0_i32 = arith.constant 0 : i32
    %c0_i32_0 = arith.constant 0 : i32
    %c0_i32_1 = arith.constant 0 : i32
    return %c0_i32, %c0_i32_0 : i32, i32
  }
  func.func @transform_14(%arg0: i32) -> (i32, i32) {
    %c0_i32 = arith.constant 0 : i32
    %c0_i32_0 = arith.constant 0 : i32
    %c0_i32_1 = arith.constant 0 : i32
    return %c0_i32, %c0_i32_0 : i32, i32
  }
  func.func @transform_15(%arg0: i32) -> (i32, i32) {
    %c0_i32 = arith.constant 0 : i32
    %c0_i32_0 = arith.constant 0 : i32
    %c0_i32_1 = arith.constant 0 : i32
    return %c0_i32, %c0_i32_0 : i32, i32
  }
  func.func @transform_16(%arg0: i32) -> (i32, i32) {
    %c0_i32 = arith.constant 0 : i32
    %c0_i32_0 = arith.constant 0 : i32
    return %c0_i32, %arg0 : i32, i32
  }
  func.func @transform_17(%arg0: i32) -> (i32, i32) {
    %c0_i32 = arith.constant 0 : i32
    %c0_i32_0 = arith.constant 0 : i32
    return %c0_i32, %arg0 : i32, i32
  }
}

</mosaic_0001>

<bundles_post_ra>
// kernel: message_module_forward.2
= control target key start
LH: loop header
LB: loop body
LE: loop exit
PB: predicated region body
PF: predicated region fallthrough
CT: control target
= control target key end

     0   :  { %s939_s21 = smov 0   ;;  %s941_s22 = smov 0   ;;  %s1051_s0 = inlined_call_operand.vmem [shape: bf16[40,256], index: 0, kind: input, shape index: {}]   ;;  %s1052_s1 = inlined_call_operand.vmem [shape: bf16[24,24], index: 1, kind: input, shape index: {}]   ;;  %s1053_s2 = inlined_call_operand.vmem [shape: bf16[16,24], index: 2, kind: input, shape index: {}]   ;;  %s1054_s3 = inlined_call_operand.vmem [shape: bf16[24,24], index: 3, kind: input, shape index: {}]   ;;  %s1055_s4 = inlined_call_operand.vmem [shape: bf16[8,16], index: 4, kind: input, shape index: {}]   ;;  %s1056_s5 = inlined_call_operand.vmem [shape: f32[8,1], index: 5, kind: input, shape index: {}]   ;;  %s1057_s6 = inlined_call_operand.vmem [shape: bf16[40,256], index: 6, kind: output, shape index: {}]  }
   0x1   :  { %s943_s23 = smov 0  }
   0x2 LB: > { %s741_s24 = sadd.s32 4294967295, %s899_s23   ;;  %s956_s25 = sadd.s32 1, %s899_s23   ;;  %s899_s23 = sphi %s943_s23, %s1061_s23   ;;  %s895_s22 = sphi %s941_s22, %s1060_s22   ;;  %s891_s21 = sphi %s939_s21, %s1059_s21  }
   0x3   : > { %s20_s26 = ssub.s32 %s899_s23, %s956_s25  ;;  %s23_s27 = sadd.s32 1, %s895_s22 }
   0x4   : > { %p21_p0 = scmp.eq.s32.totalorder %s20_s26, 0  ;;  %p30_p1 = scmp.ne.s32.totalorder %s895_s22, %s891_s21 }
   0x5   : > { %p31_p2 = scmp.eq.s32.totalorder %s899_s23, 0  ;;  %p165_p3 = scmp.eq.s32.totalorder %s741_s24, 1 }
   0x6   : > { %s967_s28 = scalar_select %p21_p0, %s895_s22, %s23_s27  }
   0x7   : > { %p32_p4 = por %p31_p2, %p30_p1  ;;  %p969_p5 = por %p165_p3, %p30_p1 }
   0x8   : > { %p744_p6 = scmp.ge.s32.totalorder %s899_s23, 2 }
   0xa   : > { %202 = sbr.rel (%p744_p6) target bundleno = 25 (0x19), region = 36 }
  0x11   : > { %205 = sbr.rel (!%p32_p4) target bundleno = 25 (0x19), region = 40  ;;  %s207_s30 = sand.u32 (%p32_p4), 1, %s895_s22  }
  0x12   : > { %s745_s7 = sshll.u32 (%p32_p4), %s899_s23, 2  ;;  %s832_s8 = smul.u32 (%p32_p4), 20, %s207_s30 }
  0x13   : > { %s211_s11 = scalar_lea.vmem (%p32_p4), %s1051_s0, %s745_s7 }
  0x14   : > { %v227_v0 = vld [vmem:[%s211_s11] sm:$0xf] (%p32_p4)  ;;  %v229_v1 = vld [vmem:[%s211_s11 + $0x8] sm:$0xf] (%p32_p4)  ;;  %v231_v2 = vld [vmem:[%s211_s11 + $0x10] sm:$0xf] (%p32_p4) }
  0x15   : > { %v233_v3 = vld [vmem:[%s211_s11 + $0x18] sm:$0xf] (%p32_p4)  ;;  %v235_v4 = vld [vmem:[%s211_s11 + $0x20] sm:$0xf] (%p32_p4)  ;;  %s209_s12 = scalar_lea.vmem (%p32_p4), [#allocation2], %s832_s8 }
  0x16   : > { %228 = vst [vmem:[%s209_s12] sm:$0xf] (%p32_p4), %v227_v0  ;;  %230 = vst [vmem:[%s209_s12 + $0x4] sm:$0xf] (%p32_p4), %v229_v1 }
  0x17   : > { %232 = vst [vmem:[%s209_s12 + $0x8] sm:$0xf] (%p32_p4), %v231_v2  ;;  %234 = vst [vmem:[%s209_s12 + $0xc] sm:$0xf] (%p32_p4), %v233_v3 }
  0x18   : > { %236 = vst [vmem:[%s209_s12 + $0x10] sm:$0xf] %v235_v4 }
  0x19 PF: > { %p746_p7 = scmp.ge.s32.totalorder %s899_s23, 1  ;;  %p268_p8 = scmp.lt.s32.totalorder %s899_s23, 3 }
  0x1b   : > { %p269_p9 = pnand %p746_p7, %p268_p8 }
  0x1c   : > { %s275_s13 = sand.u32 (!%p269_p9), 1, %s891_s21   ;;  %v864_v5 = vld [vmem:[%s1052_s1] sm:$0xff] (!%p269_p9)   ;;  %vm336_vm0 = vcmask (!%p269_p9), 195584   ;;  %vm343_vm1 = vcmask (!%p269_p9), 1043456   ;;  %v865_v9 = vld [vmem:[%s1052_s1 + $0x8] ss:$0 sps:$4 sm:$0xff] (!%p269_p9)  }
  0x1d   : > { %272 = sbr.rel (%p269_p9) target bundleno = 761 (0x2f9), region = 81  ;;  %804 = vmatprep.mubr.msk.bf16.mxu0 (!%p269_p9), %vm336_vm0, %v864_v5  ;;  %v901_v10 = vmov (!%p269_p9), 0.0   ;;  %vm902_vm2 = vmmov (!%p269_p9), 0   ;;  %v868_v31 = vld [vmem:[%s1053_s2] sm:$0xff] (!%p269_p9)   ;;  %v870_v35 = vld [vmem:[%s1054_s3 + $0x8] ss:$0 sps:$4 sm:$0xff] (!%p269_p9)  }
  0x1e   : > { %s982_s14 = smul.u32 (!%p269_p9), 20, %s275_s13  ;;  %808 = vmatprep.subr.bf16.mxu1 (!%p269_p9), %v901_v10  ;;  %812 = vmatprep.mubr.msk.bf16.mxu1 (!%p269_p9), %vm902_vm2, %v901_v10  ;;  %v869_v34 = vld [vmem:[%s1054_s3] sm:$0xff] (!%p269_p9)   ;;  %v903_v37 = vmov (!%p269_p9), 0   ;;  %vm476_vm5 = vcmask (!%p269_p9), 130048  }
  0x1f   : > { %v318_v36 = vld [vmem:[%s1056_s5] sm:$0xff] (!%p269_p9)  ;;  %861 = vset.pattern.permute.xlu0 (!%p269_p9), %v903_v37 }
  0x20   : > { %s989_s17 = scalar_lea.vmem (!%p269_p9), [#allocation2], %s982_s14  ;;  %473 = vperm.xlu0 (!%p269_p9), %861, %v318_v36   ;;  %s1021_s10 = scalar_lea.vmem (!%p269_p9), [#allocation3], %s982_s14  ;;  %v317_v43 = vld [vmem:[%s1055_s4] sm:$0xf] (!%p269_p9) }
  0x21   : > { %v862_v6 = vld [vmem:[%s989_s17 + $0x8] sm:$0xff] (!%p269_p9)   ;;  %v863_v7 = vld [vmem:[%s989_s17 + $0x10] ss:$0 sps:$4 sm:$0xff] (!%p269_p9)   ;;  %v866_v25 = vld [vmem:[%s989_s17] ss:$0 sps:$4 sm:$0xff] (!%p269_p9)  }
  0x22   : > { %800 = vmatprep.subr.bf16.mxu0 (!%p269_p9), %v862_v6  ;;  %v345_v8 = vsel (!%p269_p9), %vm343_vm1, %v863_v7, 0  ;;  %v867_v28 = vld [vmem:[%s989_s17 + $0x4] ss:$0 sps:$4 sm:$0xff] (!%p269_p9)  }
  0x23   : > { %801 = vmatpush3.bf16.msra.mxu0 (!%p269_p9), %v862_v6  ;;  %v427_v30 = vsel (!%p269_p9), %vm343_vm1, %v867_v28, 0 }
  0x24   : > { %830 = vmatprep.subr.msk.bf16.mxu0 %vm343_vm1, %v863_v7  ;;  %s768_s13 = sshll.u32 (%p969_p5), %s741_s24, 2 }
  0x25   : > { %s629_s16 = scalar_lea.vmem (%p969_p5), %s1057_s6, %s768_s13 }
  0x27   : > { %803 = vmatpush3.bf16.msra.mxu0 %v345_v8 }
  0x28   : > { %816 = vmatprep.subr.bf16.mxu0 %v901_v10 }
  0x2a   : > { %805 = vmatmul.mubr.msk.bf16.vlgmr.msra.gmra.mrb[0].mxu0 %vm336_vm0, %v865_v9 }
  0x2b   : > { %818 = vmatprep.mubr.msk.bf16.mxu0 %vm902_vm2, %v901_v10 }
  0x9f   : > { %v474_v48 = vpop.permute.xlu0 %473 }
  0xfd   : > { %v806_v11 = vpop.f32.mrb[0].mxu0 }
  0xfe   : > { %v381_v12 = vpop.f32.mrb[1].mxu0  ;;  %v398_v18 = vmul.f32 %v806_v11, %v806_v11  ;;  %v527_v32 = vpack.c.bf16 %v806_v11, %v806_v11 }
  0xff   : > { %v807_v13 = vpop.f32.mrb[2].mxu0  ;;  %v395_v15 = vmul.f32 %v381_v12, %v381_v12 }
 0x100   : > { %v384_v14 = vpop.f32.mrb[3].mxu0  ;;  %v543_v33 = vsel %vm343_vm1, %v527_v32, 0 }
 0x101   : > { %v396_v16 = vmul.f32 %v384_v14, %v384_v14  ;;  %v526_v17 = vpack.c.bf16 %v384_v14, %v381_v12 }
 0x103   : > { %v397_v19 = vadd.f32 %v396_v16, %v395_v15 }
 0x105   : > { %v399_v20 = vadd.f32 %v398_v18, %v397_v19 }
 0x107   : > { %871 = vrsqrt.f32 %v399_v20  ;;  %vm402_vm3 = vcmp.eq.f32.partialorder %v399_v20, inf  ;;  %v405_v23 = vand.u32 2147483648, %v399_v20  ;;  %vm404_vm4 = vcmp.eq.f32.partialorder %v399_v20, 0.0 }
 0x111   : > { %v872_v21 = vpop.eup %871 }
 0x112   : > { %v401_v22 = vmul.f32 %v872_v21, %v399_v20 }
 0x114   : > { %v403_v24 = vsel %vm402_vm3, %v399_v20, %v401_v22 }
 0x115   : > { %v406_v26 = vsel %vm404_vm4, %v405_v23, %v403_v24 }
 0x116   : > { %v407_v27 = vpack.c.bf16 %v406_v26, %v406_v26 }
 0x118   : > { %v416_v29 = vsel %vm343_vm1, %v407_v27, %v866_v25 }
 0x119   : > { %809 = vmatpush3.bf16.msra.mxu1 %v416_v29 }
 0x11a   : > { %810 = vmatprep.subr.bf16.mxu1 %v901_v10 }
 0x11d   : > { %811 = vmatpush3.bf16.msra.mxu1 %v427_v30 }
 0x11e   : > { %822 = vmatprep.subr.bf16.mxu1 %v526_v17 }
 0x120   : > { %813 = vmatmul.mubr.msk.bf16.vlgmr.msra.gmra.mrb[0].mxu1 %vm336_vm0, %v868_v31 }
 0x121   : > { %823 = vmatpush3.bf16.msra.mxu1 %v526_v17  ;;  %826 = vmatprep.mubr.msk.bf16.mxu1 %vm336_vm0, %v869_v34 }
 0x122   : > { %831 = vmatprep.subr.msk.bf16.mxu1 %vm343_vm1, %v527_v32 }
 0x125   : > { %825 = vmatpush3.bf16.msra.mxu1 %v543_v33 }
 0x128   : > { %827 = vmatmul.mubr.msk.bf16.vlgmr.msra.gmra.mrb[4].mxu1 %vm336_vm0, %v870_v35 }
 0x1f3   : > { %v463_v38 = vpop.f32.mrb[0].mxu1 }
 0x1f4   : > { %v814_v39 = vpop.f32.mrb[1].mxu1 }
 0x1f5   : > { %v466_v40 = vpop.f32.mrb[2].mxu1 }
 0x1f6   : > { %v470_v41 = vpack.c.bf16 %v466_v40, %v463_v38  ;;  %v815_v42 = vpop.f32.mrb[3].mxu1 }
 0x1f8   : > { %780 = vst [vmem:[%s1021_s10] sm:$0xff] %v470_v41   ;;  %817 = vmatpush3.bf16.msra.mxu0 %v470_v41 }
 0x1fb   : > { %819 = vmatmul.mubr.msk.bf16.vlgmr.msra.gmra.mrb[4].mxu0 %vm476_vm5, %v317_v43  ;;  %v828_v44 = vpop.f32.mrb[4].mxu1 }
 0x1fc   : > { %v579_v45 = vpop.f32.mrb[5].mxu1 }
 0x1fd   : > { %v829_v46 = vpop.f32.mrb[6].mxu1 }
 0x1fe   : > { %v582_v47 = vpop.f32.mrb[7].mxu1 }
 0x1ff   : > { %v645_v63 = vld [vmem:[%s1021_s10] sm:$0xf] (%p969_p5)  ;;  %v647_v0 = vld [vmem:[%s1021_s10 + $0x4] sm:$0xf] (%p969_p5) }
 0x200   : > { %646 = vst [vmem:[%s629_s16] sm:$0xf] (%p969_p5), %v645_v63  ;;  %648 = vst [vmem:[%s629_s16 + $0x8] sm:$0xf] (%p969_p5), %v647_v0 }
 0x2ce   : > { %v514_v49 = vpop.f32.mrb[4].mxu0 }
 0x2cf   : > { %v515_v50 = vadd.f32 %v514_v49, %v474_v48  ;;  %v820_v51 = vpop.f32.mrb[5].mxu0 }
 0x2d0   : > { %v517_v52 = vpop.f32.mrb[6].mxu0 }
 0x2d1   : > { %v758_v53 = vmul.f32 -1.442695, %v515_v50  ;;  %v821_v54 = vpop.f32.mrb[7].mxu0 }
 0x2d3   : > { %873 = vpow2.f32 %v758_v53 }
 0x2dd   : > { %v874_v55 = vpop.eup %873 }
 0x2de   : > { %v523_v56 = vadd.f32 1.0, %v874_v55 }
 0x2e0   : > { %875 = vrcp.f32 %v523_v56 }
 0x2e9   : > { %627 = sbr.rel (!%p969_p5) target bundleno = 761 (0x2f9), region = 89 }
 0x2ea   : > { %v876_v57 = vpop.eup %875 }
 0x2eb   : > { %v595_v58 = vmul.f32 %v876_v57, %v828_v44  ;;  %v593_v59 = vmul.f32 %v876_v57, %v579_v45  ;;  %v594_v60 = vmul.f32 %v876_v57, %v582_v47 }
 0x2ed   : > { %v775_v61 = vpack.c.bf16 %v595_v58, %v595_v58  ;;  %v784_v62 = vpack.c.bf16 %v594_v60, %v593_v59 }
 0x2ef   : > { %620 = vst [vmem:[%s1021_s10 + $0x10] sm:$0xf] %v775_v61  ;;  %786 = vst [vmem:[%s1021_s10 + $0x8] sm:$0xff] %v784_v62  }
 0x2f6   : > { %v649_v1 = vld [vmem:[%s1021_s10 + $0x8] sm:$0xf]  ;;  %v651_v2 = vld [vmem:[%s1021_s10 + $0xc] sm:$0xf]  ;;  %v653_v3 = vld [vmem:[%s1021_s10 + $0x10] sm:$0xf] }
 0x2f7   : > { %650 = vst [vmem:[%s629_s16 + $0x10] sm:$0xf] %v649_v1  ;;  %652 = vst [vmem:[%s629_s16 + $0x18] sm:$0xf] %v651_v2 }
 0x2f8   : > { %654 = vst [vmem:[%s629_s16 + $0x20] sm:$0xf] %v653_v3 }
 0x2f9 PF: > { %p13_p10 = scmp.ge.s32.totalorder %s956_s25, 4   ;;  %s1059_s21 = smov %s895_s22 }
 0x2fa   : > { %s1060_s22 = smov %s967_s28  ;;  %s1061_s23 = smov %s956_s25 }
 0x2fb   :  { %15 = sbr.rel (!%p13_p10) target bundleno = 2 (0x2), region = 161 }

// kernel: message_module_forward.3
= control target key start
LH: loop header
LB: loop body
LE: loop exit
PB: predicated region body
PF: predicated region fallthrough
CT: control target
= control target key end

     0   :  { %s3440_s0 = inlined_call_operand.vmem [shape: s32[1,512], index: 0, kind: input, shape index: {}]   ;;  %s3441_s1 = inlined_call_operand.vmem [shape: bf16[40,256], index: 1, kind: input, shape index: {}]   ;;  %s3442_s2 = inlined_call_operand.vmem [shape: bf16[40,512], index: 2, kind: input, shape index: {}]   ;;  %s3443_s3 = inlined_call_operand.vmem [shape: bf16[24,24], index: 3, kind: input, shape index: {}]   ;;  %s3444_s4 = inlined_call_operand.vmem [shape: bf16[16,24], index: 4, kind: input, shape index: {}]   ;;  %s3445_s5 = inlined_call_operand.vmem [shape: bf16[24,24], index: 5, kind: input, shape index: {}]   ;;  %s3446_s6 = inlined_call_operand.vmem [shape: bf16[8,16], index: 6, kind: input, shape index: {}]   ;;  %s3447_s7 = inlined_call_operand.vmem [shape: bf16[24,24], index: 7, kind: input, shape index: {}]   ;;  %s3448_s8 = inlined_call_operand.vmem [shape: bf16[24,16], index: 8, kind: input, shape index: {}]   ;;  %s3449_s9 = inlined_call_operand.vmem [shape: bf16[8,16], index: 9, kind: input, shape index: {}]   ;;  %s3450_s10 = inlined_call_operand.vmem [shape: bf16[24,24], index: 10, kind: input, shape index: {}]   ;;  %s3451_s11 = inlined_call_operand.vmem [shape: bf16[24,24], index: 11, kind: input, shape index: {}]   ;;  %s3452_s12 = inlined_call_operand.vmem [shape: bf16[16,24], index: 12, kind: input, shape index: {}]   ;;  %s3453_s13 = inlined_call_operand.vmem [shape: bf16[24,24], index: 13, kind: input, shape index: {}]   ;;  %s3454_s14 = inlined_call_operand.vmem [shape: bf16[8,16], index: 14, kind: input, shape index: {}]   ;;  %s3455_s15 = inlined_call_operand.vmem [shape: f32[72,1], index: 15, kind: input, shape index: {}]   ;;  %s3456_s16 = inlined_call_operand.hbm [shape: f32[16,512], index: 16, kind: output, shape index: {0}]   ;;  %s3457_s17 = inlined_call_operand.hbm [shape: f32[24,512], index: 17, kind: output, shape index: {1}]  }
   0x1   :  { %3462 = sst [smem:[#allocation10_spill]] %s3440_s0 }
   0x2   :  { %3463 = sst [smem:[#allocation11_spill]] %s3441_s1 }
   0x3   :  { %3464 = sst [smem:[#allocation12_spill]] %s3442_s2 }
   0x4   :  { %3465 = sst [smem:[#allocation13_spill]] %s3443_s3 }
   0x5   :  { %3466 = sst [smem:[#allocation14_spill]] %s3444_s4 }
   0x6   :  { %3467 = sst [smem:[#allocation15_spill]] %s3445_s5 }
   0x7   :  { %3468 = sst [smem:[#allocation16_spill]] %s3446_s6 }
   0x8   :  { %3469 = sst [smem:[#allocation17_spill]] %s3447_s7 }
   0x9   :  { %23 = vsyncpa [#allocation4], 0 }
   0xa   :  { %25 = vsyncpa [#allocation4 + $0x1], 0 }
   0xb   :  { %26 = vsyncpa [#allocation6], 0 }
   0xc   :  { %28 = vsyncpa [#allocation6 + $0x1], 0  ;;  %s2746_s24 = smov 0   ;;  %s2748_s25 = smov 0  }
   0xd   :  { %s2750_s26 = smov 0   ;;  %s2752_s27 = smov 0  }
   0xe LB: > { %s2767_s28 = sadd.s32 4294967295, %s2647_s27   ;;  %s2231_s29 = sadd.s32 4294967294, %s2647_s27   ;;  %s2647_s27 = sphi %s2752_s27, %s3489_s27   ;;  %s2643_s26 = sphi %s2750_s26, %s3488_s26   ;;  %s2639_s25 = sphi %s2748_s25, %s3487_s25   ;;  %s2635_s24 = sphi %s2746_s24, %s3486_s24  }
   0xf   : > { %s2771_s0 = sadd.s32 1, %s2647_s27   ;;  %s88_s30 = sadd.s32 1, %s2643_s26 }
  0x10   : > { %s85_s18 = ssub.s32 %s2647_s27, %s2771_s0  ;;  %p95_p0 = scmp.ne.s32.totalorder %s2643_s26, %s2639_s25 }
  0x11   : > { %p86_p1 = scmp.eq.s32.totalorder %s85_s18, 0  ;;  %p96_p2 = scmp.eq.s32.totalorder %s2647_s27, 0 }
  0x12   : > { %p398_p3 = scmp.eq.s32.totalorder %s2767_s28, 1  ;;  %p403_p4 = scmp.ne.s32.totalorder %s2639_s25, %s2635_s24 }
  0x13   : > { %s2783_s19 = scalar_select %p86_p1, %s2643_s26, %s88_s30  }
  0x14   : > { %p97_p5 = por %p96_p2, %p95_p0  ;;  %p2785_p6 = por %p398_p3, %p95_p0 }
  0x15   : > { %3470 = sst [smem:[#allocation9_spill]] %s2783_s19  ;;  %p404_p7 = scmp.eq.s32.totalorder %s2231_s29, 1 }
  0x16   : > { %p2233_p9 = scmp.ge.s32.totalorder %s2647_s27, 2 }
  0x17   : > { %p2789_p8 = por %p404_p7, %p403_p4 }
  0x18   : > { %488 = sbr.rel (%p2233_p9) target bundleno = 44 (0x2c), region = 72 }
  0x1f   : > { %499 = sbr.rel (!%p97_p5) target bundleno = 44 (0x2c), region = 80  ;;  %s501_s21 = sand.u32 (%p97_p5), 1, %s2643_s26  }
  0x20   : > { %s2435_s22 = sshll.u32 (%p97_p5), %s2647_s27, 3  ;;  %s2438_s23 = smul.u32 (%p97_p5), 40, %s501_s21 }
  0x21   : > { %s3473_s2 = sld [smem:[#allocation12_spill]] (%p97_p5) }
  0x22   : > { %s503_s29 = scalar_lea.vmem (%p97_p5), [#allocation2], %s2438_s23 }
  0x27   : > { %s506_s19 = scalar_lea.vmem %s3473_s2, %s2435_s22 }
  0x28   : > { %v542_v0 = vld [vmem:[%s506_s19] sm:$0xff]  ;;  %v544_v1 = vld [vmem:[%s506_s19 + $0x10] sm:$0xff] }
  0x29   : > { %v546_v2 = vld [vmem:[%s506_s19 + $0x20] sm:$0xff]  ;;  %v548_v3 = vld [vmem:[%s506_s19 + $0x30] sm:$0xff]  ;;  %543 = vst [vmem:[%s503_s29] sm:$0xff] %v542_v0  ;;  %545 = vst [vmem:[%s503_s29 + $0x8] sm:$0xff] %v544_v1 }
  0x2a   : > { %v550_v4 = vld [vmem:[%s506_s19 + $0x40] sm:$0xff]  ;;  %547 = vst [vmem:[%s503_s29 + $0x10] sm:$0xff] %v546_v2  ;;  %549 = vst [vmem:[%s503_s29 + $0x18] sm:$0xff] %v548_v3 }
  0x2b   : > { %551 = vst [vmem:[%s503_s29 + $0x20] sm:$0xff] %v550_v4 }
  0x2c PF: > { %p2236_p10 = scmp.ge.s32.totalorder %s2647_s27, 1  ;;  %p556_p11 = scmp.lt.s32.totalorder %s2647_s27, 3 }
  0x2e   : > { %p557_p12 = pnand %p2236_p10, %p556_p11 }
  0x2f   : > { %s2804_s21 = sand.u32 (!%p557_p12), 1, %s2639_s25   ;;  %v2649_v5 = vmov (!%p557_p12), 0   ;;  %vm1044_vm0 = vcmask (!%p557_p12), 1043456   ;;  %vm1037_vm1 = vcmask (!%p557_p12), 195584   ;;  %s3474_s3 = sld [smem:[#allocation13_spill]] (!%p557_p12)  ;;  %v632_v56 = vld [vmem:[%s3455_s15] sm:$0xff] (!%p557_p12)  ;;  %v642_v57 = vlaneseq (!%p557_p12) }
  0x30   : > { %560 = sbr.rel (%p557_p12) target bundleno = 2010 (0x7da), region = 118  ;;  %1083 = vmatprep.mubr.bf16.mxu1 (!%p557_p12), %v2649_v5  ;;  %2490 = vset.pattern.permute.xlu0 (!%p557_p12), %v2649_v5  ;;  %s3475_s4 = sld [smem:[#allocation14_spill]] (!%p557_p12)  ;;  %v635_v58 = vld [vmem:[%s3455_s15 + $0x18] sm:$0xff] (!%p557_p12)  ;;  %v638_v63 = vld [vmem:[%s3455_s15 + $0x30] sm:$0xff] (!%p557_p12) }
  0x31   : > { %s2439_s22 = smul.u32 (!%p557_p12), 40, %s2804_s21  ;;  %2491 = vset.pattern.permute.xlu1 (!%p557_p12), %v2649_v5  ;;  %s2238_s18 = sshll.u32 (!%p557_p12), %s2767_s28, 1  ;;  %1207 = vperm.xlu0 (!%p557_p12), %2490, %v632_v56   ;;  %v2873_v59 = vshrl.u32 (!%p557_p12), %v642_v57, 7 }
  0x32   : > { %p624_p13 = scmp.lt.s32.totalorder (!%p557_p12), %s2238_s18, 3  ;;  %s3477_s6 = sld [smem:[#allocation16_spill]] (!%p557_p12) }
  0x33   : > { %s2810_s19 = scalar_lea.vmem (!%p557_p12), [#allocation2], %s2439_s22  ;;  %v681_v60 = vsub.s32 (!%p557_p12), 1, %v2873_v59  ;;  %v677_v61 = vsub.s32 (!%p557_p12), 0, %v2873_v59  ;;  %v644_v62 = vadd.s32 (!%p557_p12), 8, %v2873_v59  ;;  %v645_v1 = vadd.s32 (!%p557_p12), 16, %v2873_v59  ;;  %s3478_s5 = sld [smem:[#allocation15_spill]] (!%p557_p12) }
  0x34   : > { %v2492_v6 = vld [vmem:[%s2810_s19 + $0x14] ss:$8 sps:$4 sm:$0xff] (!%p557_p12)   ;;  %v2494_v7 = vld [vmem:[%s2810_s19 + $0x10] ss:$8 sps:$4 sm:$0xff] (!%p557_p12)   ;;  %v1004_v8 = vld [vmem:[%s2810_s19 + $0x20] sm:$0xff] (!%p557_p12)  ;;  %v646_v2 = vadd.s32 (!%p557_p12), 24, %v2873_v59 }
  0x35   : > { %1051 = vmatprep.subr.bf16.mxu1 (!%p557_p12), %v2492_v6  ;;  %v2378_v9 = vcombine.high (!%p557_p12), %v1004_v8, %v1004_v8  ;;  %v2377_v10 = vcombine.low (!%p557_p12), %v1004_v8, %v1004_v8  ;;  %v2497_v12 = vld [vmem:[%s3474_s3] sm:$0xff] (!%p557_p12)   ;;  %v2498_v13 = vld [vmem:[%s3474_s3 + $0x8] ss:$0 sps:$4 sm:$0xff] (!%p557_p12)   ;;  %1519 = vperm.xlu0 (!%p557_p12), %2490, %v635_v58   ;;  %v647_v6 = vadd.s32 (!%p557_p12), 32, %v2873_v59  ;;  %v672_v56 = vadd.s32 (!%p557_p12), 232, %v2873_v59  ;;  %s3480_s7 = sld [smem:[#allocation17_spill]] (!%p557_p12) }
  0x36   : > { %1052 = vmatpush1.bf16.msra.mxu1 (!%p557_p12), %v2494_v7  ;;  %v1000_v36 = vld [vmem:[%s2810_s19] sm:$0xff] (!%p557_p12)  ;;  %v1001_v45 = vld [vmem:[%s2810_s19 + $0x8] sm:$0xff] (!%p557_p12)  ;;  %s3476_s19 = sld [smem:[#allocation10_spill]] (!%p557_p12)  ;;  %v648_v7 = vadd.s32 (!%p557_p12), 40, %v2873_v59  ;;  %v673_v57 = vadd.s32 (!%p557_p12), 240, %v2873_v59  ;;  %v674_v58 = vadd.s32 (!%p557_p12), 248, %v2873_v59 }
  0x37   : > { %2379 = vmatprep.subr.msk.bf16.mxu1 %vm1044_vm0, %v2378_v9  ;;  %v1046_v11 = vsel %vm1044_vm0, %v2377_v10, 0  ;;  %v2383_v43 = vcombine.high %v1000_v36, %v1000_v36  ;;  %v2382_v48 = vcombine.low %v1000_v36, %v1000_v36  ;;  %v2385_v50 = vcombine.high %v1001_v45, %v1001_v45  ;;  %v2503_v55 = vld [vmem:[%s3475_s4] sm:$0xff]   ;;  %s3491_s18 = smov (!%p624_p13, %s2238_s18), 3  ;;  %v633_v8 = vld [vmem:[%s3455_s15 + $0x8] sm:$0xff]  ;;  %s2237_s29 = sshll.u32 %s2804_s21, 5 }
  0x38   : > { %v2384_v51 = vcombine.low %v1001_v45, %v1001_v45  ;;  %v2650_v9 = vmov 1.0|1.0   ;;  %v649_v10 = vadd.s32 48, %v2873_v59  ;;  %v1013_v36 = vld [vmem:[%s3477_s6] sm:$0xf]  ;;  %v661_v45 = vadd.s32 144, %v2873_v59 }
  0x39   : > { %1657 = vperm.xlu0 %2490, %v638_v63   ;;  %s615_s22 = scalar_lea.vmem [#allocation3], %s2237_s29  ;;  %s3459_s6 = sshll.u32 %s2767_s28, 8 }
  0x3a   : > { %1054 = vmatpush1.bf16.msra.mxu1 %v1046_v11  ;;  %v1155_v54 = vsel %vm1044_vm0, %v2384_v51, 0  ;;  %v650_v11 = vadd.s32 56, %v2873_v59  ;;  %v667_v51 = vadd.s32 192, %v2873_v59  ;;  %s3351_s3 = scalar_lea.hbm %s3456_s16, %s3459_s6 }
  0x3c   : > { %s626_s30 = scalar_lea.vmem %s3476_s19, %s3491_s18  ;;  %s3479_s18 = sld [smem:[#allocation11_spill]] }
  0x3d   : > { %2380 = vmatmul.mubr.msk.bf16.vlgmr.msra.gmra.mrb[0].mxu1 %vm1037_vm1, %v2497_v12  ;;  %v641_v0 = vld [vmem:[%s626_s30] sm:$0x3]  ;;  %1509 = vperm.xlu0 %2490, %v633_v8  }
  0x3e   : > { %1093 = vmatprep.mubr.bf16.mxu1 %v2649_v5  ;;  %v2886_v3 = vrot.slane %v641_v0, %v681_v60  ;;  %v2888_v4 = vrot.slane %v641_v0, %v677_v61  ;;  %v640_v12 = vld [vmem:[%s3455_s15 + $0x40] sm:$0xff] }
  0x40   : > { %vm684_vm6 = vcmp.eq.s32.totalorder %v2873_v59, %v2886_v3  ;;  %vm686_vm7 = vcmp.eq.s32.totalorder %v644_v62, %v2886_v3  ;;  %vm683_vm8 = vcmp.eq.s32.totalorder %v2873_v59, %v2888_v4  ;;  %vm685_vm9 = vcmp.eq.s32.totalorder %v644_v62, %v2888_v4 }
  0x41   : > { %vm2309_vm10 = vmpackc.low %vm686_vm7, %vm684_vm6  ;;  %vm688_vm11 = vcmp.eq.s32.totalorder %v645_v1, %v2886_v3  ;;  %vm690_vm12 = vcmp.eq.s32.totalorder %v646_v2, %v2886_v3  ;;  %vm687_vm13 = vcmp.eq.s32.totalorder %v645_v1, %v2888_v4  ;;  %vm689_vm14 = vcmp.eq.s32.totalorder %v646_v2, %v2888_v4  ;;  %1937 = vperm.xlu0 %2490, %v640_v12   ;;  %v636_v2 = vld [vmem:[%s3455_s15 + $0x20] sm:$0xff] }
  0x42   : > { %2310 = vmatprep.subr.msk.bf16.mxu0 %vm2309_vm10, %v2650_v9  ;;  %vm2311_vm15 = vmpackc.low %vm685_vm9, %vm683_vm8  ;;  %vm691_vm7 = vcmp.eq.s32.totalorder %v647_v6, %v2888_v4  ;;  %vm693_vm8 = vcmp.eq.s32.totalorder %v648_v7, %v2888_v4  ;;  %vm696_vm9 = vcmp.eq.s32.totalorder %v649_v10, %v2886_v3  ;;  %vm698_vm10 = vcmp.eq.s32.totalorder %v650_v11, %v2886_v3  ;;  %v2508_v60 = vld [vmem:[%s3479_s18] ss:$8 sps:$4 sm:$0xff]   ;;  %v2512_v61 = vld [vmem:[%s3479_s18 + $0x14] ss:$8 sps:$4 sm:$0xff]  }
  0x43   : > { %2312 = vmatpush1.bf16.msk.msra.mxu0 %vm2311_vm15, %v2650_v9  ;;  %v2514_v62 = vld [vmem:[%s3479_s18 + $0x10] ss:$8 sps:$4 sm:$0xff]   ;;  %v911_v63 = vld [vmem:[%s3479_s18 + $0x20] sm:$0xff]  ;;  %1596 = vperm.xlu1 %2491, %v636_v2  }
  0x44   : > { %v2308_v0 = vcombine.high %v911_v63, %v911_v63  ;;  %v2307_v1 = vcombine.low %v911_v63, %v911_v63 }
  0x45   : > { %2381 = vmatmul.mubr.msk.bf16.gmra.mrb[4].mxu1 %vm1037_vm1, %v2498_v13 }
  0x46   : > { %1192 = vmatprep.mubr.bf16.mxu1 %v2649_v5 }
 0x110   : > { %v2827_v14 = vpop.f32.mrb[0].mxu1 }
 0x111   : > { %v2829_v15 = vpop.f32.mrb[1].mxu1  ;;  %v1102_v17 = vmul.f32 %v2827_v14, %v2827_v14 }
 0x112   : > { %v2831_v16 = vpop.f32.mrb[2].mxu1  ;;  %v1103_v21 = vmul.f32 %v2829_v15, %v2829_v15 }
 0x113   : > { %v1104_v18 = vmul.f32 %v2831_v16, %v2831_v16  ;;  %v1267_v19 = vpack.c.bf16 %v2831_v16, %v2827_v14  ;;  %v2839_v20 = vpop.f32.mrb[3].mxu1  ;;  %v2505_v14 = vld [vmem:[%s3478_s5 + $0x8] ss:$0 sps:$4 sm:$0xff]   ;;  %v651_v16 = vadd.s32 64, %v2873_v59 }
 0x114   : > { %v1105_v22 = vmul.f32 %v2839_v20, %v2839_v20  ;;  %v1268_v23 = vpack.c.bf16 %v2839_v20, %v2829_v15  ;;  %v2504_v15 = vld [vmem:[%s3478_s5] sm:$0xff]   ;;  %v653_v20 = vadd.s32 80, %v2873_v59  ;;  %s2106_s5 = sshll.u32 %s615_s22, 4  ;;  %s3343_s5 = int_to_ptr.vmem [resolvable:$true] %s2106_s5 }
 0x115   : > { %v1106_v24 = vadd.f32 %v1104_v18, %v1102_v17  ;;  %s2553_s29 = scalar_lea.vmem %s3343_s5, 512 }
 0x116   : > { %v1107_v25 = vadd.f32 %v1105_v22, %v1103_v21  ;;  %p2554_p0 = scmp.ne.s32.totalorder %s3343_s5, %s2553_s29 }
 0x118   : > { %v2847_v26 = vpop.f32.mrb[4].mxu1  ;;  %p2555_p1 = pnand %p2554_p0, %p2785_p6 }
 0x119   : > { %v1108_v27 = vmul.f32 %v2847_v26, %v2847_v26  ;;  %v2851_v28 = vpop.f32.mrb[5].mxu1 }
 0x11a   : > { %v1109_v29 = vmul.f32 %v2851_v28, %v2851_v28  ;;  %v1099_v30 = vpop.f32.mrb[6].mxu1  ;;  %p2556_p2 = pneg %p2555_p1 }
 0x11b   : > { %v1110_v31 = vadd.f32 %v1108_v27, %v1106_v24  ;;  %v1100_v32 = vpop.f32.mrb[7].mxu1 }
 0x11c   : > { %v1111_v33 = vadd.f32 %v1109_v29, %v1107_v25 }
 0x11d   : > { %2525 = vrsqrt.f32 %v1110_v31  ;;  %vm1114_vm2 = vcmp.eq.f32.partialorder %v1110_v31, inf  ;;  %v1117_v39 = vand.u32 2147483648, %v1110_v31  ;;  %vm1116_vm4 = vcmp.eq.f32.partialorder %v1110_v31, 0.0 }
 0x11e   : > { %2527 = vrsqrt.f32 %v1111_v33  ;;  %vm1121_vm3 = vcmp.eq.f32.partialorder %v1111_v33, inf  ;;  %v1124_v40 = vand.u32 2147483648, %v1111_v33  ;;  %vm1123_vm5 = vcmp.eq.f32.partialorder %v1111_v33, 0.0 }
 0x127   : > { %v2526_v34 = vpop.eup %2525 }
 0x128   : > { %v2528_v35 = vpop.eup %2527  ;;  %v1113_v37 = vmul.f32 %v2526_v34, %v1110_v31 }
 0x129   : > { %v1120_v38 = vmul.f32 %v2528_v35, %v1111_v33 }
 0x12a   : > { %v1115_v41 = vsel %vm1114_vm2, %v1110_v31, %v1113_v37  ;;  %vm692_vm2 = vcmp.eq.s32.totalorder %v647_v6, %v2886_v3  ;;  %v634_v6 = vld [vmem:[%s3455_s15 + $0x10] sm:$0xff] }
 0x12b   : > { %v1122_v42 = vsel %vm1121_vm3, %v1111_v33, %v1120_v38  ;;  %v1118_v44 = vsel %vm1116_vm4, %v1117_v39, %v1115_v41  ;;  %vm694_vm3 = vcmp.eq.s32.totalorder %v648_v7, %v2886_v3  ;;  %vm2313_vm4 = vmpackc.low %vm690_vm12, %vm688_vm11  ;;  %v1269_v38 = vpack.c.bf16 %v2847_v26, %v2847_v26  ;;  %v1208_v7 = vpop.permute.xlu0 %1207 }
 0x12c   : > { %v1125_v46 = vsel %vm1123_vm5, %v1124_v40, %v1122_v42  ;;  %v1126_v47 = vpack.c.bf16 %v1118_v44, %v1118_v44  ;;  %2314 = vmatprep.subr.msk.bf16.mxu0 %vm2313_vm4, %v2650_v9  ;;  %vm2315_vm5 = vmpackc.low %vm689_vm14, %vm687_vm13  ;;  %v1270_v39 = vpack.c.bf16 %v2851_v28, %v2851_v28  ;;  %vm695_vm4 = vcmp.eq.s32.totalorder %v649_v10, %v2888_v4 }
 0x12d   : > { %v1127_v49 = vpack.c.bf16 %v1125_v46, %v1125_v46  ;;  %vm2317_vm6 = vmpackc.low %vm694_vm3, %vm692_vm2  ;;  %2316 = vmatpush1.bf16.msk.msra.mxu0 %vm2315_vm5, %v2650_v9  ;;  %vm1210_vm3 = vcmask 130048   ;;  %v1286_v40 = vsel %vm1044_vm0, %v1269_v38, 0  ;;  %vm697_vm5 = vcmp.eq.s32.totalorder %v650_v11, %v2888_v4 }
 0x12e   : > { %v1140_v53 = vsel %vm1044_vm0, %v1126_v47, %v2382_v48  ;;  %2318 = vmatprep.subr.msk.bf16.mxu0 %vm2317_vm6, %v2650_v9  ;;  %vm2319_vm11 = vmpackc.low %vm693_vm8, %vm691_vm7  ;;  %vm700_vm7 = vcmp.eq.s32.totalorder %v651_v16, %v2886_v3  ;;  %v655_v26 = vadd.s32 96, %v2873_v59  ;;  %v656_v28 = vadd.s32 104, %v2873_v59 }
 0x12f   : > { %v1144_v52 = vsel %vm1044_vm0, %v1127_v49, %v2383_v43  ;;  %vm2321_vm12 = vmpackc.low %vm698_vm10, %vm696_vm9  ;;  %vm699_vm10 = vcmp.eq.s32.totalorder %v651_v16, %v2888_v4  ;;  %v657_v41 = vadd.s32 112, %v2873_v59  ;;  %v658_v42 = vadd.s32 120, %v2873_v59 }
 0x130   : > { %1160 = vmatprep.subr.bf16.mxu1 %v1144_v52  ;;  %vm2323_vm6 = vmpackc.low %vm697_vm5, %vm695_vm4  ;;  %v659_v43 = vadd.s32 128, %v2873_v59  ;;  %v660_v44 = vadd.s32 136, %v2873_v59  ;;  %v662_v46 = vadd.s32 152, %v2873_v59  ;;  %v663_v47 = vadd.s32 160, %v2873_v59 }
 0x131   : > { %1161 = vmatpush1.bf16.msra.mxu1 %v1140_v53  ;;  %2320 = vmatpush1.bf16.msk.msra.mxu0 %vm2319_vm11, %v2650_v9  ;;  %v664_v48 = vadd.s32 168, %v2873_v59  ;;  %v665_v49 = vadd.s32 176, %v2873_v59  ;;  %v668_v52 = vadd.s32 200, %v2873_v59  ;;  %v669_v53 = vadd.s32 208, %v2873_v59 }
 0x132   : > { %2387 = vmatprep.subr.msk.bf16.mxu1 %vm1044_vm0, %v2385_v50  ;;  %2322 = vmatprep.subr.msk.bf16.mxu0 %vm2321_vm12, %v2650_v9  ;;  %v666_v50 = vadd.s32 184, %v2873_v59 }
 0x135   : > { %1163 = vmatpush1.bf16.msra.mxu1 %v1155_v54  ;;  %2324 = vmatpush1.bf16.msk.msra.mxu0 %vm2323_vm6, %v2650_v9  ;;  %vm708_vm6 = vcmp.eq.s32.totalorder %v655_v26, %v2886_v3  ;;  %v670_v54 = vadd.s32 216, %v2873_v59 }
 0x138   : > { %2388 = vmatmul.mubr.msk.bf16.vlgmr.msra.gmra.mrb[8].mxu1 %vm1037_vm1, %v2503_v55  ;;  %v671_v55 = vadd.s32 224, %v2873_v59 }
 0x139   : > { %1246 = vmatprep.mubr.bf16.mxu1 %v2649_v5 }
 0x20b   : > { %v1194_v13 = vpop.f32.mrb[8].mxu1 }
 0x20c   : > { %v1494_v17 = vmul.f32 0.01, %v1194_v13  ;;  %v1196_v18 = vpop.f32.mrb[9].mxu1  ;;  %vm1490_vm13 = vcmp.ge.f32.partialorder %v1194_v13, 0.0 }
 0x20d   : > { %v1495_v21 = vmul.f32 0.01, %v1196_v18  ;;  %v1198_v22 = vpop.f32.mrb[10].mxu1  ;;  %vm1491_vm14 = vcmp.ge.f32.partialorder %v1196_v18, 0.0 }
 0x20e   : > { %v1203_v24 = vpack.c.bf16 %v1198_v22, %v1194_v13  ;;  %vm1492_vm15 = vcmp.ge.f32.partialorder %v1198_v22, 0.0  ;;  %v1496_v25 = vmul.f32 0.01, %v1198_v22  ;;  %v1200_v27 = vpop.f32.mrb[11].mxu1  ;;  %v2923_v31 = vsel %vm1490_vm13, %v1194_v13, %v1494_v17 }
 0x20f   : > { %vm1493_vm2 = vcmp.ge.f32.partialorder %v1200_v27, 0.0  ;;  %v1497_v29 = vmul.f32 0.01, %v1200_v27  ;;  %v1204_v30 = vpack.c.bf16 %v1200_v27, %v1196_v18  ;;  %v2929_v34 = vsel %vm1491_vm14, %v1196_v18, %v1495_v21 }
 0x210   : > { %v2925_v32 = vsel %vm1492_vm15, %v1198_v22, %v1496_v25  ;;  %vm704_vm13 = vcmp.eq.s32.totalorder %v653_v20, %v2886_v3 }
 0x211   : > { %v1505_v33 = vpack.c.bf16 %v2925_v32, %v2923_v31  ;;  %1214 = vmatprep.subr.bf16.mxu1 %v1204_v30  ;;  %v2931_v35 = vsel %vm1493_vm2, %v1200_v27, %v1497_v29  ;;  %vm703_vm2 = vcmp.eq.s32.totalorder %v653_v20, %v2888_v4  ;;  %v2515_v31 = vld [vmem:[%s3448_s8 + $0x8] ss:$0 sps:$4 sm:$0xff]  }
 0x212   : > { %1215 = vmatpush1.bf16.msra.mxu1 %v1203_v24  ;;  %v1506_v37 = vpack.c.bf16 %v2931_v35, %v2929_v34  ;;  %v2511_v34 = vld [vmem:[%s3448_s8] sm:$0xff]  }
 0x213   : > { %1291 = vmatprep.subr.bf16.mxu1 %v1268_v23  ;;  %v654_v23 = vadd.s32 88, %v2873_v59 }
 0x215   : > { %2389 = vmatmul.mubr.msk.bf16.vlgmr.msra.gmra.mrb[12].mxu1 %vm1210_vm3, %v1013_v36  ;;  %vm706_vm14 = vcmp.eq.s32.totalorder %v654_v23, %v2886_v3  ;;  %vm705_vm4 = vcmp.eq.s32.totalorder %v654_v23, %v2888_v4 }
 0x216   : > { %1292 = vmatpush1.bf16.msra.mxu1 %v1267_v19  ;;  %1323 = vmatprep.mubr.bf16.mxu1 %v2649_v5  ;;  %v652_v19 = vadd.s32 72, %v2873_v59  ;;  %vm2329_vm15 = vmpackc.low %vm706_vm14, %vm704_vm13  ;;  %vm714_vm13 = vcmp.eq.s32.totalorder %v658_v42, %v2886_v3  ;;  %v2510_v59 = vld [vmem:[%s3479_s18 + $0x4] ss:$8 sps:$4 sm:$0xff]  }
 0x217   : > { %2394 = vmatprep.subr.msk.bf16.mxu1 %vm1044_vm0, %v1270_v39  ;;  %vm2331_vm5 = vmpackc.low %vm705_vm4, %vm703_vm2  ;;  %vm713_vm2 = vcmp.eq.s32.totalorder %v658_v42, %v2888_v4  ;;  %971 = vmatprep.mubr.bf16.mxu0 %v2510_v59  ;;  %v1591_v59 = vld [vmem:[%s3449_s9] sm:$0xf] }
 0x218   : > { %vm702_vm8 = vcmp.eq.s32.totalorder %v652_v19, %v2886_v3  ;;  %vm701_vm11 = vcmp.eq.s32.totalorder %v652_v19, %v2888_v4 }
 0x219   : > { %vm2325_vm9 = vmpackc.low %vm702_vm8, %vm700_vm7  ;;  %vm710_vm7 = vcmp.eq.s32.totalorder %v656_v28, %v2886_v3 }
 0x21a   : > { %1294 = vmatpush1.bf16.msra.mxu1 %v1286_v40  ;;  %2326 = vmatprep.subr.msk.bf16.mxu0 %vm2325_vm9, %v2650_v9  ;;  %vm2327_vm12 = vmpackc.low %vm701_vm11, %vm699_vm10  ;;  %vm707_vm9 = vcmp.eq.s32.totalorder %v655_v26, %v2888_v4  ;;  %vm709_vm10 = vcmp.eq.s32.totalorder %v656_v28, %v2888_v4 }
 0x21b   : > { %2328 = vmatpush1.bf16.msk.msra.mxu0 %vm2327_vm12, %v2650_v9  ;;  %vm2333_vm8 = vmpackc.low %vm710_vm7, %vm708_vm6  ;;  %vm712_vm12 = vcmp.eq.s32.totalorder %v657_v41, %v2886_v3  ;;  %vm718_vm6 = vcmp.eq.s32.totalorder %v660_v44, %v2886_v3 }
 0x21c   : > { %2330 = vmatprep.subr.msk.bf16.mxu0 %vm2329_vm15, %v2650_v9  ;;  %vm2335_vm11 = vmpackc.low %vm709_vm10, %vm707_vm9  ;;  %vm711_vm15 = vcmp.eq.s32.totalorder %v657_v41, %v2888_v4  ;;  %vm717_vm9 = vcmp.eq.s32.totalorder %v660_v44, %v2888_v4 }
 0x21d   : > { %2395 = vmatmul.mubr.msk.bf16.vlgmr.msra.gmra.mrb[16].mxu1 %vm1037_vm1, %v2504_v15  ;;  %vm2337_vm14 = vmpackc.low %vm714_vm13, %vm712_vm12  ;;  %vm722_vm12 = vcmp.eq.s32.totalorder %v662_v46, %v2886_v3 }
 0x21e   : > { %1333 = vmatprep.mubr.bf16.mxu1 %v2649_v5  ;;  %vm2339_vm4 = vmpackc.low %vm713_vm2, %vm711_vm15  ;;  %vm721_vm15 = vcmp.eq.s32.totalorder %v662_v46, %v2888_v4 }
 0x21f   : > { %2332 = vmatpush1.bf16.msk.msra.mxu0 %vm2331_vm5, %v2650_v9  ;;  %vm716_vm5 = vcmp.eq.s32.totalorder %v659_v43, %v2886_v3 }
 0x220   : > { %2334 = vmatprep.subr.msk.bf16.mxu0 %vm2333_vm8, %v2650_v9  ;;  %vm2341_vm7 = vmpackc.low %vm718_vm6, %vm716_vm5  ;;  %vm715_vm8 = vcmp.eq.s32.totalorder %v659_v43, %v2888_v4  ;;  %vm726_vm5 = vcmp.eq.s32.totalorder %v664_v48, %v2886_v3 }
 0x221   : > { %vm2343_vm10 = vmpackc.low %vm717_vm9, %vm715_vm8  ;;  %vm725_vm8 = vcmp.eq.s32.totalorder %v664_v48, %v2888_v4  ;;  %v2507_v48 = vld [vmem:[%s3480_s7 + $0x8] ss:$0 sps:$4 sm:$0xff]  }
 0x223   : > { %2336 = vmatpush1.bf16.msk.msra.mxu0 %vm2335_vm11, %v2650_v9  ;;  %vm720_vm11 = vcmp.eq.s32.totalorder %v661_v45, %v2886_v3 }
 0x224   : > { %2338 = vmatprep.subr.msk.bf16.mxu0 %vm2337_vm14, %v2650_v9  ;;  %vm2345_vm13 = vmpackc.low %vm722_vm12, %vm720_vm11  ;;  %vm719_vm14 = vcmp.eq.s32.totalorder %v661_v45, %v2888_v4  ;;  %vm730_vm11 = vcmp.eq.s32.totalorder %v666_v50, %v2886_v3  ;;  %vm727_vm12 = vcmp.eq.s32.totalorder %v665_v49, %v2888_v4 }
 0x225   : > { %2396 = vmatmul.mubr.msk.bf16.gmra.mrb[20].mxu1 %vm1037_vm1, %v2505_v14  ;;  %vm2347_vm2 = vmpackc.low %vm721_vm15, %vm719_vm14 }
 0x226   : > { %1407 = vmatprep.mubr.bf16.mxu1 %v2649_v5 }
 0x227   : > { %2340 = vmatpush1.bf16.msk.msra.mxu0 %vm2339_vm4, %v2650_v9  ;;  %vm724_vm4 = vcmp.eq.s32.totalorder %v663_v47, %v2886_v3 }
 0x228   : > { %2342 = vmatprep.subr.msk.bf16.mxu0 %vm2341_vm7, %v2650_v9  ;;  %vm2349_vm6 = vmpackc.low %vm726_vm5, %vm724_vm4  ;;  %vm723_vm7 = vcmp.eq.s32.totalorder %v663_v47, %v2888_v4  ;;  %vm734_vm4 = vcmp.eq.s32.totalorder %v668_v52, %v2886_v3  ;;  %v2506_v47 = vld [vmem:[%s3480_s7] sm:$0xff]  }
 0x229   : > { %vm2351_vm9 = vmpackc.low %vm725_vm8, %vm723_vm7  ;;  %vm733_vm7 = vcmp.eq.s32.totalorder %v668_v52, %v2888_v4 }
 0x22b   : > { %2344 = vmatpush1.bf16.msk.msra.mxu0 %vm2343_vm10, %v2650_v9  ;;  %vm728_vm10 = vcmp.eq.s32.totalorder %v665_v49, %v2886_v3 }
 0x22c   : > { %2346 = vmatprep.subr.msk.bf16.mxu0 %vm2345_vm13, %v2650_v9  ;;  %vm729_vm13 = vcmp.eq.s32.totalorder %v666_v50, %v2888_v4  ;;  %vm2353_vm14 = vmpackc.low %vm730_vm11, %vm728_vm10  ;;  %vm738_vm10 = vcmp.eq.s32.totalorder %v670_v54, %v2886_v3 }
 0x22d   : > { %vm2355_vm15 = vmpackc.low %vm729_vm13, %vm727_vm12  ;;  %vm735_vm12 = vcmp.eq.s32.totalorder %v669_v53, %v2888_v4  ;;  %vm737_vm13 = vcmp.eq.s32.totalorder %v670_v54, %v2888_v4 }
 0x22f   : > { %2348 = vmatpush1.bf16.msk.msra.mxu0 %vm2347_vm2, %v2650_v9  ;;  %vm732_vm2 = vcmp.eq.s32.totalorder %v667_v51, %v2886_v3 }
 0x230   : > { %2350 = vmatprep.subr.msk.bf16.mxu0 %vm2349_vm6, %v2650_v9  ;;  %vm2357_vm5 = vmpackc.low %vm734_vm4, %vm732_vm2  ;;  %vm731_vm6 = vcmp.eq.s32.totalorder %v667_v51, %v2888_v4  ;;  %vm742_vm2 = vcmp.eq.s32.totalorder %v672_v56, %v2886_v3 }
 0x231   : > { %vm2359_vm8 = vmpackc.low %vm733_vm7, %vm731_vm6  ;;  %vm741_vm6 = vcmp.eq.s32.totalorder %v672_v56, %v2888_v4 }
 0x233   : > { %2352 = vmatpush1.bf16.msk.msra.mxu0 %vm2351_vm9, %v2650_v9  ;;  %vm736_vm9 = vcmp.eq.s32.totalorder %v669_v53, %v2886_v3 }
 0x234   : > { %2354 = vmatprep.subr.msk.bf16.mxu0 %vm2353_vm14, %v2650_v9  ;;  %vm2361_vm11 = vmpackc.low %vm738_vm10, %vm736_vm9  ;;  %vm746_vm9 = vcmp.eq.s32.totalorder %v674_v58, %v2886_v3  ;;  %vm743_vm10 = vcmp.eq.s32.totalorder %v673_v57, %v2888_v4 }
 0x235   : > { %vm2363_vm14 = vmpackc.low %vm737_vm13, %vm735_vm12 }
 0x237   : > { %2356 = vmatpush1.bf16.msk.msra.mxu0 %vm2355_vm15, %v2650_v9  ;;  %vm740_vm15 = vcmp.eq.s32.totalorder %v671_v55, %v2886_v3 }
 0x238   : > { %2358 = vmatprep.subr.msk.bf16.mxu0 %vm2357_vm5, %v2650_v9  ;;  %vm2365_vm4 = vmpackc.low %vm742_vm2, %vm740_vm15  ;;  %vm739_vm5 = vcmp.eq.s32.totalorder %v671_v55, %v2888_v4 }
 0x239   : > { %vm2367_vm7 = vmpackc.low %vm741_vm6, %vm739_vm5 }
 0x23b   : > { %2360 = vmatpush1.bf16.msk.msra.mxu0 %vm2359_vm8, %v2650_v9  ;;  %vm744_vm8 = vcmp.eq.s32.totalorder %v673_v57, %v2886_v3  ;;  %v637_v3 = vld [vmem:[%s3455_s15 + $0x28] sm:$0xff] }
 0x23c   : > { %2362 = vmatprep.subr.msk.bf16.mxu0 %vm2361_vm11, %v2650_v9  ;;  %vm745_vm11 = vcmp.eq.s32.totalorder %v674_v58, %v2888_v4  ;;  %vm2369_vm12 = vmpackc.low %vm746_vm9, %vm744_vm8  ;;  %1652 = vperm.xlu1 %2491, %v637_v3   ;;  %v639_v4 = vld [vmem:[%s3455_s15 + $0x38] sm:$0xff] }
 0x23d   : > { %vm2371_vm13 = vmpackc.low %vm745_vm11, %vm743_vm10 }
 0x23f   : > { %2364 = vmatpush1.bf16.msk.msra.mxu0 %vm2363_vm14, %v2650_v9 }
 0x240   : > { %2366 = vmatprep.subr.msk.bf16.mxu0 %vm2365_vm4, %v2650_v9  ;;  %1662 = vperm.xlu1 %2491, %v639_v4  }
 0x243   : > { %2368 = vmatpush1.bf16.msk.msra.mxu0 %vm2367_vm7, %v2650_v9 }
 0x244   : > { %2370 = vmatprep.subr.msk.bf16.mxu0 %vm2369_vm12, %v2650_v9  ;;  %1514 = vperm.xlu1 %2491, %v634_v6  }
 0x247   : > { %2372 = vmatpush1.bf16.msk.msra.mxu0 %vm2371_vm13, %v2650_v9 }
 0x24a   : > { %972 = vmatmul.mubr.bf16.vlgmr.msra.gmra.mrb[0].mxu0 %v2508_v60  ;;  %v3166_v60 = vpop.permute.xlu1 %1596 }
 0x24b   : > { %981 = vmatprep.mubr.bf16.mxu0 %v2512_v61 }
 0x252   : > { %982 = vmatmul.mubr.bf16.gmra.mrb[4].mxu0 %v2514_v62 }
 0x253   : > { %991 = vmatprep.mubr.bf16.mxu0 %v2308_v0  ;;  %v1520_v0 = vpop.permute.xlu0 %1519 }
 0x25a   : > { %992 = vmatmul.mubr.bf16.gmra.mrb[8].mxu0 %v2307_v1 }
 0x25b   : > { %1634 = vmatprep.mubr.bf16.mxu0 %v2649_v5 }
 0x2e8   : > { %v1248_v8 = vpop.f32.mrb[12].mxu1 }
 0x2e9   : > { %v1249_v9 = vadd.f32 %v1248_v8, %v1208_v7  ;;  %v1250_v10 = vpop.f32.mrb[13].mxu1 }
 0x2ea   : > { %v1251_v11 = vadd.f32 %v1250_v10, %v1208_v7  ;;  %v1252_v12 = vpop.f32.mrb[14].mxu1 }
 0x2eb   : > { %v2390_v13 = vmul.f32 -1.442695, %v1249_v9  ;;  %v1253_v17 = vpop.f32.mrb[15].mxu1 }
 0x2ec   : > { %v2391_v18 = vmul.f32 -1.442695, %v1251_v11  ;;  %v3192_v11 = vpop.permute.xlu1 %1652 }
 0x2ed   : > { %2529 = vpow2.f32 %v2390_v13 }
 0x2ee   : > { %2531 = vpow2.f32 %v2391_v18 }
 0x2f0   : > { %v1325_v21 = vpop.f32.mrb[16].mxu1 }
 0x2f1   : > { %v1327_v22 = vpop.f32.mrb[17].mxu1 }
 0x2f2   : > { %v1329_v24 = vpop.f32.mrb[18].mxu1 }
 0x2f3   : > { %v1331_v25 = vpop.f32.mrb[19].mxu1 }
 0x2f7   : > { %v2530_v27 = vpop.eup %2529 }
 0x2f8   : > { %v2532_v29 = vpop.eup %2531  ;;  %v1261_v30 = vadd.f32 1.0, %v2530_v27  ;;  %v1335_v36 = vpop.f32.mrb[20].mxu1 }
 0x2f9   : > { %v1262_v38 = vadd.f32 1.0, %v2532_v29  ;;  %v1337_v39 = vpop.f32.mrb[21].mxu1 }
 0x2fa   : > { %2533 = vrcp.f32 %v1261_v30  ;;  %v1339_v40 = vpop.f32.mrb[22].mxu1 }
 0x2fb   : > { %2535 = vrcp.f32 %v1262_v38  ;;  %v1340_v15 = vpop.f32.mrb[23].mxu1  ;;  %v3198_v38 = vpop.permute.xlu1 %1662 }
 0x304   : > { %v2534_v14 = vpop.eup %2533 }
 0x305   : > { %v2536_v16 = vpop.eup %2535  ;;  %v3089_v19 = vmul.f32 %v2534_v14, %v1325_v21  ;;  %v3091_v20 = vmul.f32 %v2534_v14, %v1329_v24  ;;  %v3093_v23 = vmul.f32 %v2534_v14, %v1335_v36 }
 0x306   : > { %v3095_v26 = vmul.f32 %v2536_v16, %v1327_v22  ;;  %v3097_v28 = vmul.f32 %v2536_v16, %v1331_v25  ;;  %v3099_v41 = vmul.f32 %v2536_v16, %v1337_v39  ;;  %v3194_v22 = vpop.permute.xlu0 %1657 }
 0x307   : > { %v1351_v43 = vpack.c.bf16 %v3091_v20, %v3089_v19  ;;  %v1353_v45 = vpack.c.bf16 %v3093_v23, %v3093_v23 }
 0x308   : > { %v1352_v42 = vpack.c.bf16 %v3097_v28, %v3095_v26  ;;  %v1354_v44 = vpack.c.bf16 %v3099_v41, %v3099_v41 }
 0x309   : > { %v1370_v46 = vsel %vm1044_vm0, %v1353_v45, 0 }
 0x30a   : > { %1375 = vmatprep.subr.bf16.mxu1 %v1352_v42 }
 0x30b   : > { %1376 = vmatpush1.bf16.msra.mxu1 %v1351_v43 }
 0x30c   : > { %2399 = vmatprep.subr.msk.bf16.mxu1 %vm1044_vm0, %v1354_v44  ;;  %v1510_v44 = vpop.permute.xlu0 %1509 }
 0x30f   : > { %1378 = vmatpush1.bf16.msra.mxu1 %v1370_v46  ;;  %v1515_v46 = vpop.permute.xlu1 %1514 }
 0x310   : > { %1536 = vmatprep.subr.bf16.mxu1 %v1506_v37 }
 0x312   : > { %2400 = vmatmul.mubr.msk.bf16.vlgmr.msra.gmra.mrb[24].mxu1 %vm1037_vm1, %v2506_v47 }
 0x313   : > { %1537 = vmatpush1.bf16.msra.mxu1 %v1505_v33  ;;  %1417 = vmatprep.mubr.bf16.mxu1 %v2649_v5 }
 0x31a   : > { %2401 = vmatmul.mubr.msk.bf16.gmra.mrb[28].mxu1 %vm1037_vm1, %v2507_v48 }
 0x31b   : > { %1568 = vmatprep.mubr.bf16.mxu1 %v2649_v5 }
 0x31d   : > { %v3137_v32 = vpop.f32.mrb[0].mxu0 }
 0x31e   : > { %v3139_v33 = vpop.f32.mrb[1].mxu0 }
 0x31f   : > { %v3141_v35 = vpop.f32.mrb[2].mxu0 }
 0x320   : > { %v3143_v37 = vpop.f32.mrb[3].mxu0  ;;  %v1592_v57 = vpack.c.bf16 %v3141_v35, %v3137_v32 }
 0x321   : > { %v1593_v58 = vpack.c.bf16 %v3143_v37, %v3139_v33 }
 0x322   : > { %2404 = vmatmul.mubr.msk.bf16.vlgmr.msra.gmra.mrb[32].mxu1 %vm1210_vm3, %v2511_v34 }
 0x323   : > { %1578 = vmatprep.mubr.bf16.mxu1 %v2649_v5  ;;  %1602 = vmatprep.subr.bf16.mxu0 %v1593_v58 }
 0x324   : > { %1603 = vmatpush1.bf16.msra.mxu0 %v1592_v57 }
 0x325   : > { %v3145_v49 = vpop.f32.mrb[4].mxu0 }
 0x326   : > { %v3147_v50 = vpop.f32.mrb[5].mxu0 }
 0x327   : > { %v3149_v51 = vpop.f32.mrb[6].mxu0  ;;  %2406 = vmatmul.mubr.msk.bf16.vlgmr.msra.gmra.mrb[12].mxu0 %vm1210_vm3, %v1591_v59 }
 0x328   : > { %v3151_v52 = vpop.f32.mrb[7].mxu0  ;;  %1821 = vmatprep.mubr.bf16.mxu0 %v2649_v5 }
 0x32a   : > { %2405 = vmatmul.mubr.msk.bf16.gmra.mrb[36].mxu1 %vm1210_vm3, %v2515_v31 }
 0x32b   : > { %1717 = vmatprep.mubr.bf16.mxu1 %v2649_v5 }
 0x32d   : > { %v3153_v53 = vpop.f32.mrb[8].mxu0 }
 0x32e   : > { %v3155_v54 = vpop.f32.mrb[9].mxu0 }
 0x32f   : > { %v997_v55 = vpop.f32.mrb[10].mxu0 }
 0x330   : > { %v998_v56 = vpop.f32.mrb[11].mxu0 }
 0x3e5   : > { %v3168_v61 = vpop.f32.mrb[24].mxu1 }
 0x3e6   : > { %v3170_v62 = vpop.f32.mrb[25].mxu1  ;;  %v1426_v1 = vmul.f32 %v3168_v61, %v3089_v19  ;;  %v1436_v2 = vmul.f32 %v3168_v61, %v3168_v61 }
 0x3e7   : > { %v3172_v63 = vpop.f32.mrb[26].mxu1  ;;  %v1427_v7 = vmul.f32 %v3170_v62, %v3095_v26  ;;  %v1437_v8 = vmul.f32 %v3170_v62, %v3170_v62 }
 0x3e8   : > { %v1428_v3 = vmul.f32 %v3172_v63, %v3091_v20  ;;  %v1438_v4 = vmul.f32 %v3172_v63, %v3172_v63  ;;  %v3182_v6 = vpop.f32.mrb[27].mxu1 }
 0x3e9   : > { %v1429_v9 = vmul.f32 %v3182_v6, %v3097_v28  ;;  %v1439_v10 = vmul.f32 %v3182_v6, %v3182_v6 }
 0x3ea   : > { %v1430_v12 = vadd.f32 %v1428_v3, %v1426_v1  ;;  %v1440_v13 = vadd.f32 %v1438_v4, %v1436_v2 }
 0x3eb   : > { %v1431_v17 = vadd.f32 %v1429_v9, %v1427_v7  ;;  %v1441_v18 = vadd.f32 %v1439_v10, %v1437_v8  ;;  %v1454_v7 = vmul.f32 0.01, %v3089_v19  ;;  %v1455_v10 = vmul.f32 0.01, %v3095_v26 }
 0x3ed   : > { %v1419_v21 = vpop.f32.mrb[28].mxu1 }
 0x3ee   : > { %v1432_v24 = vmul.f32 %v1419_v21, %v3093_v23  ;;  %v1442_v25 = vmul.f32 %v1419_v21, %v1419_v21  ;;  %v1421_v27 = vpop.f32.mrb[29].mxu1 }
 0x3ef   : > { %v1433_v29 = vmul.f32 %v1421_v27, %v3099_v41  ;;  %v1443_v30 = vmul.f32 %v1421_v27, %v1421_v27  ;;  %v1423_v36 = vpop.f32.mrb[30].mxu1 }
 0x3f0   : > { %v3200_v39 = vadd.f32 %v1432_v24, %v1430_v12  ;;  %v1444_v40 = vadd.f32 %v1442_v25, %v1440_v13  ;;  %v1424_v15 = vpop.f32.mrb[31].mxu1 }
 0x3f1   : > { %v3202_v14 = vadd.f32 %v1433_v29, %v1431_v17  ;;  %v1445_v16 = vadd.f32 %v1443_v30, %v1441_v18  ;;  %v1467_v17 = vmul.f32 0.01, %v3097_v28  ;;  %v1479_v18 = vmul.f32 0.01, %v3099_v41 }
 0x3f2   : > { %v1446_v42 = vadd.f32 1e-06, %v1444_v40  ;;  %vm1452_vm14 = vcmp.ge.f32.partialorder %v3200_v39, 0.0 }
 0x3f3   : > { %v1447_v43 = vadd.f32 1e-06, %v1445_v16  ;;  %vm1453_vm15 = vcmp.ge.f32.partialorder %v3202_v14, 0.0 }
 0x3f4   : > { %2537 = vrcp.f32 %v1446_v42 }
 0x3f5   : > { %2539 = vrcp.f32 %v1447_v43  ;;  %v1570_v45 = vpop.f32.mrb[32].mxu1 }
 0x3f6   : > { %v1571_v47 = vadd.f32 %v1570_v45, %v1510_v44  ;;  %v1572_v48 = vpop.f32.mrb[33].mxu1 }
 0x3f7   : > { %v1573_v34 = vadd.f32 %v1572_v48, %v1510_v44  ;;  %v1574_v31 = vpop.f32.mrb[34].mxu1 }
 0x3f8   : > { %v3205_v55 = vmul.f32 %v1571_v47, %v3137_v32  ;;  %v1575_v56 = vadd.f32 %v1574_v31, %v1515_v46  ;;  %v1576_v57 = vpop.f32.mrb[35].mxu1 }
 0x3f9   : > { %v3208_v58 = vmul.f32 %v1573_v34, %v3139_v33  ;;  %v1577_v59 = vadd.f32 %v1576_v57, %v1515_v46 }
 0x3fa   : > { %v3211_v1 = vmul.f32 %v1575_v56, %v3141_v35  ;;  %v1466_v35 = vmul.f32 0.01, %v3091_v20 }
 0x3fb   : > { %v3214_v2 = vmul.f32 %v1577_v59, %v3143_v37 }
 0x3fc   : > { %v1754_v3 = vpack.c.bf16 %v3211_v1, %v3205_v55  ;;  %v2522_v55 = vld [vmem:[%s3452_s12] sm:$0xff]  }
 0x3fd   : > { %v1755_v4 = vpack.c.bf16 %v3214_v2, %v3208_v58  ;;  %v1580_v32 = vpop.f32.mrb[36].mxu1 }
 0x3fe   : > { %v2538_v8 = vpop.eup %2537  ;;  %v1581_v9 = vadd.f32 %v1580_v32, %v1520_v0  ;;  %v1582_v33 = vpop.f32.mrb[37].mxu1 }
 0x3ff   : > { %v2540_v12 = vpop.eup %2539  ;;  %v1450_v37 = vmul.f32 %v2538_v8, %v3200_v39  ;;  %v1583_v13 = vadd.f32 %v1582_v33, %v1520_v0  ;;  %v1584_v24 = vpop.f32.mrb[38].mxu1 }
 0x400   : > { %v1451_v25 = vmul.f32 %v2540_v12, %v3202_v14  ;;  %v3228_v29 = vmul.f32 %v1581_v9, %v3145_v49  ;;  %v3231_v30 = vmul.f32 %v1581_v9, %v3149_v51  ;;  %v3234_v36 = vmul.f32 %v1581_v9, %v3153_v53  ;;  %v1585_v40 = vpop.f32.mrb[39].mxu1 }
 0x401   : > { %v1456_v15 = vmul.f32 %v1450_v37, %v3168_v61  ;;  %v1468_v0 = vmul.f32 %v1450_v37, %v3172_v63  ;;  %v1480_v16 = vmul.f32 %v1450_v37, %v1419_v21  ;;  %v3239_v42 = vmul.f32 %v1583_v13, %v3147_v50 }
 0x402   : > { %v1457_v43 = vmul.f32 %v1451_v25, %v3170_v62  ;;  %v1469_v49 = vmul.f32 %v1451_v25, %v3182_v6  ;;  %v1481_v44 = vmul.f32 %v1451_v25, %v1421_v27  ;;  %v3244_v51 = vmul.f32 %v1583_v13, %v3151_v52 }
 0x403   : > { %v1458_v53 = vsub.f32 %v3089_v19, %v1456_v15  ;;  %v1470_v45 = vsub.f32 %v3091_v20, %v1468_v0  ;;  %v1482_v61 = vsub.f32 %v3093_v23, %v1480_v16  ;;  %v3250_v63 = vmul.f32 %v1583_v13, %v3155_v54 }
 0x404   : > { %v1483_v50 = vsub.f32 %v3099_v41, %v1481_v44  ;;  %v1459_v62 = vsub.f32 %v3095_v26, %v1457_v43  ;;  %v1471_v6 = vsub.f32 %v3097_v28, %v1469_v49 }
 0x405   : > { %v1460_v52 = vsel %vm1452_vm14, %v3089_v19, %v1458_v53  ;;  %v1472_v21 = vsel %vm1452_vm14, %v3091_v20, %v1470_v45  ;;  %v1484_v27 = vsel %vm1452_vm14, %v3093_v23, %v1482_v61  ;;  %v1478_v20 = vmul.f32 0.01, %v3093_v23  ;;  %v2519_v23 = vld [vmem:[%s3450_s10 + $0x8] ss:$0 sps:$4 sm:$0xff]  }
 0x406   : > { %v1462_v46 = vmul.f32 0.99, %v1460_v52  ;;  %v1474_v47 = vmul.f32 0.99, %v1472_v21  ;;  %v1485_v54 = vsel %vm1453_vm15, %v3099_v41, %v1483_v50  ;;  %v1461_v39 = vsel %vm1453_vm15, %v3095_v26, %v1459_v62 }
 0x407   : > { %v1463_v48 = vmul.f32 0.99, %v1461_v39  ;;  %v1473_v34 = vsel %vm1453_vm15, %v3097_v28, %v1471_v6  ;;  %v1487_v31 = vmul.f32 0.99, %v1485_v54  ;;  %v1486_v56 = vmul.f32 0.99, %v1484_v27 }
 0x408   : > { %v1475_v57 = vmul.f32 0.99, %v1473_v34  ;;  %v1464_v59 = vadd.f32 %v1462_v46, %v1454_v7  ;;  %v1476_v19 = vadd.f32 %v1474_v47, %v1466_v35  ;;  %v2518_v28 = vld [vmem:[%s3450_s10] sm:$0xff]   ;;  %v1636_v7 = vpop.f32.mrb[12].mxu0 }
 0x409   : > { %v1465_v32 = vadd.f32 %v1463_v48, %v1455_v10  ;;  %v1489_v9 = vadd.f32 %v1487_v31, %v1479_v18  ;;  %v1488_v33 = vadd.f32 %v1486_v56, %v1478_v20  ;;  %v1638_v10 = vpop.f32.mrb[13].mxu0 }
 0x40a   : > { %v1477_v14 = vadd.f32 %v1475_v57, %v1467_v17  ;;  %v1646_v8 = vpack.c.bf16 %v1476_v19, %v1464_v59  ;;  %v1640_v35 = vpop.f32.mrb[14].mxu0  ;;  %v1637_v17 = vadd.f32 %v1636_v7, %v3166_v60  ;;  %v1639_v24 = vadd.f32 %v1638_v10, %v3166_v60 }
 0x40b   : > { %v1649_v41 = vpack.c.bf16 %v1489_v9, %v1489_v9  ;;  %v1648_v37 = vpack.c.bf16 %v1488_v33, %v1488_v33  ;;  %v1641_v13 = vpop.f32.mrb[15].mxu0 }
 0x40c   : > { %v1647_v12 = vpack.c.bf16 %v1477_v14, %v1465_v32 }
 0x40d   : > { %v1680_v26 = vsel %vm1044_vm0, %v1648_v37, 0 }
 0x40e   : > { %1685 = vmatprep.subr.bf16.mxu1 %v1647_v12 }
 0x40f   : > { %1686 = vmatpush1.bf16.msra.mxu1 %v1646_v8 }
 0x410   : > { %2409 = vmatprep.subr.msk.bf16.mxu1 %vm1044_vm0, %v1649_v41 }
 0x413   : > { %1688 = vmatpush1.bf16.msra.mxu1 %v1680_v26 }
 0x416   : > { %2410 = vmatmul.mubr.msk.bf16.vlgmr.msra.gmra.mrb[40].mxu1 %vm1037_vm1, %v2518_v28 }
 0x417   : > { %1727 = vmatprep.mubr.bf16.mxu1 %v2649_v5 }
 0x41e   : > { %2411 = vmatmul.mubr.msk.bf16.gmra.mrb[44].mxu1 %vm1037_vm1, %v2519_v23 }
 0x41f   : > { %1922 = vmatprep.mubr.bf16.mxu1 %v2649_v5 }
 0x4e9   : > { %v1719_v18 = vpop.f32.mrb[40].mxu1 }
 0x4ea   : > { %v1720_v25 = vadd.f32 %v1719_v18, %v3192_v11  ;;  %v1721_v40 = vpop.f32.mrb[41].mxu1 }
 0x4eb   : > { %v1722_v15 = vadd.f32 %v1721_v40, %v3192_v11  ;;  %v1723_v0 = vpop.f32.mrb[42].mxu1 }
 0x4ec   : > { %v1738_v16 = vmul.f32 %v1720_v25, %v1637_v17  ;;  %v1724_v43 = vadd.f32 %v1723_v0, %v3194_v22  ;;  %v1725_v49 = vpop.f32.mrb[43].mxu1 }
 0x4ed   : > { %v1739_v44 = vmul.f32 %v1722_v15, %v1639_v24  ;;  %v1726_v53 = vadd.f32 %v1725_v49, %v3194_v22 }
 0x4ee   : > { %v1740_v45 = vadd.f32 %v1738_v16, %v3228_v29  ;;  %v1744_v61 = vmul.f32 %v1724_v43, %v1637_v17  ;;  %v1868_v16 = vrot.slane %v1754_v3, 4  ;;  %v2523_v3 = vld [vmem:[%s3453_s13] sm:$0xff]  }
 0x4ef   : > { %v1741_v50 = vadd.f32 %v1739_v44, %v3239_v42  ;;  %v1745_v62 = vmul.f32 %v1726_v53, %v1639_v24  ;;  %v1869_v44 = vrot.slane %v1755_v4, 4  ;;  %v2524_v4 = vld [vmem:[%s3453_s13 + $0x8] ss:$0 sps:$4 sm:$0xff]  }
 0x4f0   : > { %v1746_v60 = vadd.f32 %v1744_v61, %v3231_v30 }
 0x4f1   : > { %v1747_v6 = vadd.f32 %v1745_v62, %v3244_v51  ;;  %v1729_v52 = vpop.f32.mrb[44].mxu1 }
 0x4f2   : > { %v1756_v11 = vpack.c.bf16 %v1746_v60, %v1740_v45  ;;  %v1730_v21 = vadd.f32 %v1729_v52, %v3198_v38  ;;  %v1731_v27 = vpop.f32.mrb[45].mxu1 }
 0x4f3   : > { %v1732_v46 = vadd.f32 %v1731_v27, %v3198_v38  ;;  %v1733_v47 = vpop.f32.mrb[46].mxu1  ;;  %v1757_v54 = vpack.c.bf16 %v1747_v6, %v1741_v50  ;;  %v2520_v38 = vld [vmem:[%s3451_s11] sm:$0xff]   ;;  %v1886_v50 = vsel %vm1044_vm0, %v1868_v16, 0 }
 0x4f4   : > { %v1750_v22 = vmul.f32 %v1730_v21, %v1637_v17  ;;  %v1734_v39 = vpop.f32.mrb[47].mxu1 }
 0x4f5   : > { %v1751_v29 = vmul.f32 %v1732_v46, %v1639_v24  ;;  %1789 = vmatprep.subr.bf16.mxu0 %v1757_v54 }
 0x4f6   : > { %v1752_v42 = vadd.f32 %v1750_v22, %v3234_v36  ;;  %1790 = vmatpush1.bf16.msra.mxu0 %v1756_v11  ;;  %v2521_v36 = vld [vmem:[%s3451_s11 + $0x8] ss:$0 sps:$4 sm:$0xff]  }
 0x4f7   : > { %v1753_v30 = vadd.f32 %v1751_v29, %v3250_v63 }
 0x4f8   : > { %v1758_v48 = vpack.c.bf16 %v1752_v42, %v1752_v42 }
 0x4f9   : > { %v1759_v51 = vpack.c.bf16 %v1753_v30, %v1753_v30 }
 0x4fa   : > { %v1784_v34 = vsel %vm1044_vm0, %v1758_v48, 0 }
 0x4fb   : > { %2414 = vmatprep.subr.msk.bf16.mxu0 %vm1044_vm0, %v1759_v51 }
 0x4fc   : > { %1792 = vmatpush1.bf16.msra.mxu0 %v1784_v34 }
 0x4ff   : > { %2415 = vmatmul.mubr.msk.bf16.vlgmr.msra.gmra.mrb[16].mxu0 %vm1037_vm1, %v2520_v38 }
 0x500   : > { %1831 = vmatprep.mubr.bf16.mxu0 %v2649_v5 }
 0x507   : > { %2416 = vmatmul.mubr.msk.bf16.gmra.mrb[20].mxu0 %vm1037_vm1, %v2521_v36 }
 0x508   : > { %1975 = vmatprep.mubr.bf16.mxu0 %v2649_v5 }
 0x5d2   : > { %v1823_v63 = vpop.f32.mrb[16].mxu0 }
 0x5d3   : > { %v1825_v31 = vpop.f32.mrb[17].mxu0  ;;  %v1840_v57 = vmul.f32 %v1823_v63, %v1823_v63 }
 0x5d4   : > { %v1827_v56 = vpop.f32.mrb[18].mxu0  ;;  %v1841_v32 = vmul.f32 %v1825_v31, %v1825_v31 }
 0x5d5   : > { %v1842_v59 = vmul.f32 %v1827_v56, %v1827_v56  ;;  %v1996_v19 = vpack.c.bf16 %v1827_v56, %v1823_v63  ;;  %v1829_v20 = vpop.f32.mrb[19].mxu0 }
 0x5d6   : > { %v1843_v14 = vmul.f32 %v1829_v20, %v1829_v20  ;;  %v1997_v8 = vpack.c.bf16 %v1829_v20, %v1825_v31 }
 0x5d7   : > { %v1844_v9 = vadd.f32 %v1842_v59, %v1840_v57 }
 0x5d8   : > { %v1845_v33 = vadd.f32 %v1843_v14, %v1841_v32 }
 0x5da   : > { %v1833_v12 = vpop.f32.mrb[20].mxu0 }
 0x5db   : > { %v1846_v41 = vmul.f32 %v1833_v12, %v1833_v12  ;;  %v1835_v37 = vpop.f32.mrb[21].mxu0  ;;  %v1998_v58 = vpack.c.bf16 %v1833_v12, %v1833_v12 }
 0x5dc   : > { %v1847_v26 = vmul.f32 %v1835_v37, %v1835_v37  ;;  %v1837_v28 = vpop.f32.mrb[22].mxu0  ;;  %v1999_v1 = vpack.c.bf16 %v1835_v37, %v1835_v37 }
 0x5dd   : > { %v1848_v23 = vadd.f32 %v1846_v41, %v1844_v9  ;;  %v1838_v7 = vpop.f32.mrb[23].mxu0  ;;  %v2015_v2 = vsel %vm1044_vm0, %v1998_v58, 0 }
 0x5de   : > { %v1849_v10 = vadd.f32 %v1847_v26, %v1845_v33 }
 0x5df   : > { %2541 = vrsqrt.f32 %v1848_v23  ;;  %vm1852_vm2 = vcmp.eq.f32.partialorder %v1848_v23, inf  ;;  %v1855_v24 = vand.u32 2147483648, %v1848_v23  ;;  %vm1854_vm5 = vcmp.eq.f32.partialorder %v1848_v23, 0.0 }
 0x5e0   : > { %2543 = vrsqrt.f32 %v1849_v10  ;;  %vm1859_vm4 = vcmp.eq.f32.partialorder %v1849_v10, inf  ;;  %v1862_v25 = vand.u32 2147483648, %v1849_v10  ;;  %vm1861_vm6 = vcmp.eq.f32.partialorder %v1849_v10, 0.0 }
 0x5e9   : > { %v2542_v35 = vpop.eup %2541 }
 0x5ea   : > { %v2544_v13 = vpop.eup %2543  ;;  %v1851_v17 = vmul.f32 %v2542_v35, %v1848_v23 }
 0x5eb   : > { %v1858_v18 = vmul.f32 %v2544_v13, %v1849_v10 }
 0x5ec   : > { %v1853_v40 = vsel %vm1852_vm2, %v1848_v23, %v1851_v17 }
 0x5ed   : > { %v1860_v15 = vsel %vm1859_vm4, %v1849_v10, %v1858_v18  ;;  %v1856_v0 = vsel %vm1854_vm5, %v1855_v24, %v1853_v40 }
 0x5ee   : > { %v1863_v43 = vsel %vm1861_vm6, %v1862_v25, %v1860_v15  ;;  %v1864_v49 = vpack.c.bf16 %v1856_v0, %v1856_v0 }
 0x5ef   : > { %v1865_v53 = vpack.c.bf16 %v1863_v43, %v1863_v43 }
 0x5f0   : > { %v1872_v45 = vsel %vm1044_vm0, %v1864_v49, %v1868_v16 }
 0x5f1   : > { %v1876_v61 = vsel %vm1044_vm0, %v1865_v53, %v1869_v44 }
 0x5f2   : > { %1890 = vmatprep.subr.bf16.mxu1 %v1876_v61 }
 0x5f3   : > { %1891 = vmatpush1.bf16.msra.mxu1 %v1872_v45 }
 0x5f4   : > { %2418 = vmatprep.subr.msk.bf16.mxu1 %vm1044_vm0, %v1869_v44 }
 0x5f7   : > { %1893 = vmatpush1.bf16.msra.mxu1 %v1886_v50 }
 0x5f8   : > { %2020 = vmatprep.subr.bf16.mxu1 %v1997_v8 }
 0x5fa   : > { %2419 = vmatmul.mubr.msk.bf16.vlgmr.msra.gmra.mrb[48].mxu1 %vm1037_vm1, %v2522_v55 }
 0x5fb   : > { %2021 = vmatpush1.bf16.msra.mxu1 %v1996_v19  ;;  %2052 = vmatprep.mubr.bf16.mxu1 %v2649_v5 }
 0x5fc   : > { %2425 = vmatprep.subr.msk.bf16.mxu1 %vm1044_vm0, %v1999_v1 }
 0x5ff   : > { %2023 = vmatpush1.bf16.msra.mxu1 %v2015_v2 }
 0x602   : > { %2426 = vmatmul.mubr.msk.bf16.vlgmr.msra.gmra.mrb[52].mxu1 %vm1037_vm1, %v2523_v3 }
 0x603   : > { %2062 = vmatprep.mubr.bf16.mxu1 %v2649_v5  ;;  %v1768_v5 = vld [vmem:[%s3454_s14] sm:$0xf] }
 0x60a   : > { %2427 = vmatmul.mubr.msk.bf16.gmra.mrb[56].mxu1 %vm1037_vm1, %v2524_v4 }
 0x6cd   : > { %v1924_v62 = vpop.f32.mrb[48].mxu1 }
 0x6ce   : > { %2077 = vst [vmem:[%s615_s22] sm:$0xff] %v1924_v62  ;;  %v1926_v60 = vpop.f32.mrb[49].mxu1 }
 0x6cf   : > { %2078 = vst [vmem:[%s615_s22 + $0x8] sm:$0xff] %v1926_v60  ;;  %v1928_v6 = vpop.f32.mrb[50].mxu1 }
 0x6d0   : > { %v1933_v52 = vpack.c.bf16 %v1928_v6, %v1924_v62  ;;  %2079 = vst [vmem:[%s615_s22 + $0x10] sm:$0xff] %v1928_v6  ;;  %v1930_v11 = vpop.f32.mrb[51].mxu1 }
 0x6d1   : > { %v1934_v21 = vpack.c.bf16 %v1930_v11, %v1926_v60  ;;  %2080 = vst [vmem:[%s615_s22 + $0x18] sm:$0xff] %v1930_v11  ;;  %s2651_s22 = smov [#allocation3]  }
 0x6d2   : > { %s2557_s23 = sshll.u32 %s2651_s22, 4  ;;  %s2558_s23 = int_to_ptr.vmem [resolvable:$false] %s2557_s23 }
 0x6d3   : > { %1943 = vmatprep.subr.bf16.mxu0 %v1934_v21  ;;  %s2559_s19 = scalar_lea.vmem %s2558_s23, 1024  ;;  %p2560_p3 = scmp.lt.s32.totalorder %s3343_s5, %s2558_s23 }
 0x6d4   : > { %1944 = vmatpush1.bf16.msra.mxu0 %v1933_v52  ;;  %p2561_p4 = scmp.lt.s32.totalorder %s2559_s19, %s2553_s29 }
 0x6d5   : > { %v3333_v27 = vpop.f32.mrb[52].mxu1 }
 0x6d6   : > { %v3335_v46 = vpop.f32.mrb[53].mxu1  ;;  %p2562_p5 = por %p2561_p4, %p2560_p3 }
 0x6d7   : > { %2420 = vmatmul.mubr.msk.bf16.vlgmr.msra.gmra.mrb[24].mxu0 %vm1210_vm3, %v1768_v5  ;;  %v3337_v47 = vpop.f32.mrb[54].mxu1 }
 0x6d8   : > { %v3339_v54 = vpop.f32.mrb[55].mxu1  ;;  %p2563_p7 = pnand %p2562_p5, %p2556_p2 }
 0x6dd   : > { %v2064_v22 = vpop.f32.mrb[56].mxu1 }
 0x6de   : > { %v3341_v39 = vpop.f32.mrb[57].mxu1 }
 0x6df   : > { %v2068_v29 = vpop.f32.mrb[58].mxu1 }
 0x6e0   : > { %v2069_v42 = vpop.f32.mrb[59].mxu1 }
 0x6e1   : > { %2566 = shalt.err (!%p2563_p7)
}
 0x6e2   : > { %s2567_s30 = scalar_lea.hbm %s3351_s3, 512  ;;  %s2571_s22 = scalar_lea.hbm %s3456_s16, 1024 }
 0x6e3   : > { %p2568_p10 = scmp.ne.s32.totalorder %s3351_s3, %s2567_s30  ;;  %p2572_p13 = scmp.lt.u32.totalorder %s3351_s3, %s3456_s16 }
 0x6e4   : > { %p2573_p0 = scmp.lt.u32.totalorder %s2571_s22, %s2567_s30  ;;  %p2575_p2 = scmp.lt.u32.totalorder %s2567_s30, %s3351_s3 }
 0x6e5   : > { %p2569_p11 = pnand %p2568_p10, %p2785_p6 }
 0x6e6   : > { %p2574_p1 = por %p2573_p0, %p2572_p13 }
 0x6e7   : > { %p2570_p12 = pneg %p2569_p11 }
 0x6e8   : > { %p2576_p3 = por %p2575_p2, %p2574_p1 }
 0x6ea   : > { %p2577_p4 = pnand %p2576_p3, %p2570_p12 }
 0x6ec   : > { %2580 = shalt.err (!%p2577_p4)
}
 0x6ed   : > { %s3460_s29 = smov 256   ;;  %s3461_s19 = smov 512   ;;  %v1938_v30 = vpop.permute.xlu0 %1937 }
 0x6ee   : > { %s2654_s7 = smov 16   ;;  %s3481_s6 = scalar_lea.sflag [#allocation4], %s2804_s21 }
 0x6ef   : > { %2441 = dma.vmem_to_hbm [thread:$0]  (%p2785_p6), %s3343_s5, 512, %s3351_s3, %s3481_s6, %s3460_s29, %s3461_s19, %s2654_s7  }
 0x6f0   : > { %s2440_s5 = smul.u32 48, %s2804_s21  ;;  %s3482_s30 = sshll.u32 %s2767_s28, 8 }
 0x6f1   : > { %s3393_s23 = scalar_lea.hbm %s3457_s17, %s3482_s30  ;;  %s2093_s6 = scalar_lea.sflag [#allocation6], %s2804_s21 }
 0x6f2   : > { %s622_s3 = scalar_lea.vmem [#allocation5], %s2440_s5  ;;  %s2655_s29 = smov [#allocation5]  }
 0x6f3   : > { %s2122_s4 = sshll.u32 %s622_s3, 4  ;;  %s2585_s28 = sshll.u32 %s2655_s29, 4  ;;  %s3383_s4 = int_to_ptr.vmem [resolvable:$true] %s2122_s4  ;;  %s2586_s28 = int_to_ptr.vmem [resolvable:$false] %s2585_s28 }
 0x6f4   : > { %s2581_s5 = scalar_lea.vmem %s3383_s4, 768  ;;  %s2587_s19 = scalar_lea.vmem %s2586_s28, 1536 }
 0x6f5   : > { %p2582_p5 = scmp.ne.s32.totalorder %s3383_s4, %s2581_s5  ;;  %p2588_p11 = scmp.lt.s32.totalorder %s3383_s4, %s2586_s28 }
 0x6f6   : > { %p2589_p12 = scmp.lt.s32.totalorder %s2587_s19, %s2581_s5 }
 0x6f7   : > { %p2583_p7 = pnand %p2582_p5, %p2785_p6 }
 0x6f8   : > { %p2590_p13 = por %p2589_p12, %p2588_p11 }
 0x6f9   : > { %p2584_p10 = pneg %p2583_p7 }
 0x6fb   : > { %p2591_p0 = pnand %p2590_p13, %p2584_p10 }
 0x7aa   : > { %v1977_v48 = vpop.f32.mrb[24].mxu0 }
 0x7ab   : > { %v1978_v51 = vadd.f32 %v1977_v48, %v1938_v30  ;;  %v1979_v34 = vpop.f32.mrb[25].mxu0 }
 0x7ac   : > { %v1980_v38 = vadd.f32 %v1979_v34, %v1938_v30  ;;  %v1981_v36 = vpop.f32.mrb[26].mxu0 }
 0x7ad   : > { %v2421_v63 = vmul.f32 -1.442695, %v1978_v51  ;;  %v1982_v31 = vpop.f32.mrb[27].mxu0 }
 0x7ae   : > { %v2422_v56 = vmul.f32 -1.442695, %v1980_v38 }
 0x7af   : > { %2545 = vpow2.f32 %v2421_v63 }
 0x7b0   : > { %2547 = vpow2.f32 %v2422_v56 }
 0x7b9   : > { %v2546_v57 = vpop.eup %2545 }
 0x7ba   : > { %v2548_v59 = vpop.eup %2547  ;;  %v1990_v19 = vadd.f32 1.0, %v2546_v57 }
 0x7bb   : > { %v1991_v20 = vadd.f32 1.0, %v2548_v59 }
 0x7bc   : > { %2549 = vrcp.f32 %v1990_v19 }
 0x7bd   : > { %2551 = vrcp.f32 %v1991_v20 }
 0x7c6   : > { %v2550_v32 = vpop.eup %2549 }
 0x7c7   : > { %v2552_v14 = vpop.eup %2551  ;;  %v2071_v8 = vmul.f32 %v2550_v32, %v3333_v27  ;;  %v2073_v9 = vmul.f32 %v2550_v32, %v3337_v47  ;;  %v2075_v33 = vmul.f32 %v2550_v32, %v2064_v22 }
 0x7c8   : > { %v2072_v12 = vmul.f32 %v2552_v14, %v3335_v46  ;;  %v2074_v41 = vmul.f32 %v2552_v14, %v3339_v54  ;;  %v2076_v37 = vmul.f32 %v2552_v14, %v3341_v39 }
 0x7c9   : > { %2081 = vst [vmem:[%s622_s3] sm:$0xff] %v2071_v8  ;;  %2083 = vst [vmem:[%s622_s3 + $0x10] sm:$0xff] %v2073_v9 }
 0x7ca   : > { %2085 = vst [vmem:[%s622_s3 + $0x20] sm:$0xff] %v2075_v33  ;;  %2082 = vst [vmem:[%s622_s3 + $0x8] sm:$0xff] %v2072_v12 }
 0x7cb   : > { %2084 = vst [vmem:[%s622_s3 + $0x18] sm:$0xff] %v2074_v41  ;;  %2086 = vst [vmem:[%s622_s3 + $0x28] sm:$0xff] %v2076_v37 }
 0x7cc   : > { %2594 = shalt.err (!%p2591_p0)
}
 0x7cd   : > { %s2595_s3 = scalar_lea.hbm %s3393_s23, 768  ;;  %s2599_s29 = scalar_lea.hbm %s3457_s17, 1536 }
 0x7ce   : > { %p2596_p1 = scmp.ne.s32.totalorder %s3393_s23, %s2595_s3  ;;  %p2600_p4 = scmp.lt.u32.totalorder %s3393_s23, %s3457_s17 }
 0x7cf   : > { %p2601_p5 = scmp.lt.u32.totalorder %s2599_s29, %s2595_s3  ;;  %p2603_p10 = scmp.lt.u32.totalorder %s2595_s3, %s3393_s23 }
 0x7d0   : > { %p2597_p2 = pnand %p2596_p1, %p2785_p6 }
 0x7d1   : > { %p2602_p7 = por %p2601_p5, %p2600_p4 }
 0x7d2   : > { %p2598_p3 = pneg %p2597_p2 }
 0x7d3   : > { %p2604_p11 = por %p2603_p10, %p2602_p7 }
 0x7d5   : > { %p2605_p12 = pnand %p2604_p11, %p2598_p3 }
 0x7d7   : > { %2608 = shalt.err (!%p2605_p12)
}
 0x7d8   : > { %s3483_s19 = smov 512   ;;  %s3484_s5 = smov 256  }
 0x7d9   : > { %2442 = dma.vmem_to_hbm [thread:$0]  (%p2785_p6), %s3383_s4, 768, %s3393_s23, %s2093_s6, %s3484_s5, %s3483_s19, %s2654_s7  }
 0x7da PF: > { %s2137_s30 = sand.u32 1, %s2635_s24   ;;  %p2446_p13 = pnand %p2233_p9, %p2789_p8 }
 0x7db   : > { %s2138_s3 = scalar_lea.sflag [#allocation4], %s2137_s30 }
 0x7dc   : > { %2626 = dma.done.wait (!%p2446_p13), %s2138_s3, 512  }
 0x7dd   : > { %2628 = vsyncadd (!%p2446_p13), %s2138_s3, 4294966784  ;;  %s2147_s1 = scalar_lea.sflag [#allocation6], %s2137_s30 }
 0x7de   : > { %2630 = dma.done.wait (!%p2446_p13), %s2147_s1, 768  }
 0x7df   : > { %2632 = vsyncadd (!%p2446_p13), %s2147_s1, 4294966528  ;;  %s3485_s21 = sld [smem:[#allocation9_spill]]  ;;  %p31_p6 = scmp.ge.s32.totalorder %s2771_s0, 4  }
 0x7e0   : > { %s3486_s24 = smov %s2639_s25  ;;  %s3487_s25 = smov %s2643_s26 }
 0x7e1   : > { %s3489_s27 = smov %s2771_s0  ;;  %33 = sbr.rel (!%p31_p6) target bundleno = 14 (0xe), region = 182 }
 0x7e5   : > { %s3488_s26 = smov %s3485_s21 }
 0x7e8   :  { %2152 = vsyncpa [#allocation4], 1 }
 0x7e9   :  { %2154 = vsyncpa [#allocation4 + $0x1], 1 }
 0x7ea   :  { %2155 = vsyncpa [#allocation6], 1 }
 0x7eb   :  { %2157 = vsyncpa [#allocation6 + $0x1], 1 }

</bundles_post_ra>
